<compile_context>
chip_gen: v5e
topology: v5e:2x2
jax: 0.10.0
libtpu: 0.0.40
codegen_flags: <defaults>
</compile_context>

<pallas_src>
import functools

import jax
import jax.numpy as jnp
from jax.experimental import pallas as pl
from jax.experimental.pallas import tpu as pltpu

LN_EPS = 1e-5                      # PyTorch nn.LayerNorm default
_SQRT_2_OVER_PI = 0.7978845608028654


def _layer_norm(x, gamma, beta):
    mu = jnp.mean(x, axis=-1, keepdims=True)
    var = jnp.mean((x - mu) ** 2, axis=-1, keepdims=True)   # biased variance (PyTorch LN)
    return (x - mu) * jax.lax.rsqrt(var + LN_EPS) * gamma + beta


def _gelu(x):
    # TODO(synk): PyTorch nn.GELU defaults to the exact erf form; Mosaic has no erf lowering,
    # so the tanh approximation is used (max abs deviation ~1e-3). Same approx in the reference.
    return 0.5 * x * (1.0 + jnp.tanh(_SQRT_2_OVER_PI * (x + 0.044715 * (x * x * x))))


# --------------------------------------------------------------------------------------
# AttentionModule kernel
# --------------------------------------------------------------------------------------
def _attention_kernel(num_heads, hidden_dim, num_features, input_dim, mxu_dtype,
                      x_ref, wqkv_ref, bqkv_ref,
                      wsq_ref, bsq_ref, gsq_ref, bsq_ln_ref,
                      wex_ref, bex_ref, gex_ref, bex_ln_ref,
                      wfc_ref, bfc_ref, gout_ref, bout_ln_ref,
                      out_ref):
    H, D, F = num_heads, hidden_dim, num_features
    FH = F * H
    HD = H * D
    FHD = F * HD
    S = x_ref.shape[0]

    def c(z):                      # MXU-input cast (identity for f32)
        return z.astype(mxu_dtype)

    xb = x_ref[...]                                                      # (S, F)

    # --- fused Q/K/V projection: one MXU matmul instead of three -------------------------
    qkv = jnp.dot(c(xb), c(wqkv_ref[...]),
                  preferred_element_type=jnp.float32) + bqkv_ref[...]    # (S, 3*FHD)
    q = qkv[:, 0:FHD]
    k = qkv[:, FHD:2 * FHD]
    v = qkv[:, 2 * FHD:3 * FHD]

    if S == 1:
        # Softmax over a single key is identity, so temporal_out == value projection (exact).
        t = v                                                            # (S, FHD)
    else:
        # --- head-batched temporal attention ------------------------------------------------
        # (F*H, S, D) head-major layout so the per-(feature, head) attention runs as two
        # batched MXU contractions instead of F*H tiny matmuls.  The re-layout below is pure
        # register slicing + concatenation (Mosaic batched dot_general needs batch dim 0).
        def to_heads(m):
            return jnp.stack([m[:, n * D:(n + 1) * D] for n in range(FH)], axis=0)

        q3 = c(to_heads(q))                                              # (FH, S, D)
        k3 = c(to_heads(k))
        v3 = c(to_heads(v))

        scale = 1.0 / (float(D) ** 0.5)
        e = jax.lax.dot_general(q3, k3, (((2,), (2,)), ((0,), (0,))),
                                preferred_element_type=jnp.float32) * scale   # (FH, S, S)
        m = jnp.max(e, axis=-1, keepdims=True)
        p = jnp.exp(e - m)
        a = p * pl.reciprocal(jnp.sum(p, axis=-1, keepdims=True), approx=True)
        t3 = jax.lax.dot_general(c(a), v3, (((2,), (1,)), ((0,), (0,))),
                                 preferred_element_type=jnp.float32)          # (FH, S, D)

        # back to the PyTorch (S, F*H*D) column ordering; stays in vregs (no scratch).
        t = jnp.concatenate([t3[n] for n in range(FH)], axis=-1)         # (S, FHD)

    # --- squeeze / excitation over (feature, head, hidden); mean over seq ----------------
    ms = jnp.mean(t, axis=0, keepdims=True)                              # (1, FHD)
    z1 = _layer_norm(jnp.dot(c(ms), c(wsq_ref[...]),
                             preferred_element_type=jnp.float32) + bsq_ref[...],
                     gsq_ref[...], bsq_ln_ref[...])                      # (1, HD//2)
    z2 = _layer_norm(jnp.dot(c(z1), c(wex_ref[...]),
                             preferred_element_type=jnp.float32) + bex_ref[...],
                     gex_ref[...], bex_ln_ref[...])                      # (1, FHD)
    exc = jax.nn.sigmoid(z2)

    sp = t * exc                                                         # (S, FHD)

    # --- output projection fused across features -----------------------------------------
    # one (F*S, HD) @ (HD, input_dim) matmul, one LayerNorm, one full-block store.
    sp2 = jnp.concatenate([sp[:, f * HD:(f + 1) * HD] for f in range(F)], axis=0)   # (F*S, HD)
    y = _layer_norm(jnp.dot(c(sp2), c(wfc_ref[...]),
                            preferred_element_type=jnp.float32) + bfc_ref[...],
                    gout_ref[...], bout_ln_ref[...])                     # (F*S, input_dim)
    out_ref[...] = jnp.concatenate([y[f * S:(f + 1) * S, :] for f in range(F)], axis=-1)


def attention_module_forward(x, params, *, num_heads, hidden_dim, mxu_dtype=jnp.float32):
    B, S, F = x.shape
    input_dim = F                     # the PyTorch forward only works when input_dim == num_features
    HD = num_heads * hidden_dim
    FHD = F * HD
    HH2 = HD // 2

    # host-side weight fusion / layout plumbing (pre-transposed to (in, out))
    wqkv = jnp.concatenate([params["wq"].T, params["wk"].T, params["wv"].T], axis=1)  # (F, 3*FHD)
    bqkv = jnp.concatenate([params["bq"], params["bk"], params["bv"]]).reshape(1, -1)

    kernel = functools.partial(_attention_kernel, num_heads, hidden_dim, F, input_dim, mxu_dtype)

    def w2d(shape):
        return pl.BlockSpec(shape, lambda b: (0, 0))

    in_specs = [
        pl.BlockSpec((None, S, F), lambda b: (b, 0, 0)),                 # x
        w2d((F, 3 * FHD)), w2d((1, 3 * FHD)),                            # fused Wqkv, bqkv
        w2d((FHD, HH2)), w2d((1, HH2)), w2d((1, HH2)), w2d((1, HH2)),    # squeeze fc + LN
        w2d((HH2, FHD)), w2d((1, FHD)), w2d((1, FHD)), w2d((1, FHD)),    # excitation fc + LN
        w2d((HD, input_dim)), w2d((1, input_dim)),                       # out fc
        w2d((1, input_dim)), w2d((1, input_dim)),                        # out LN
    ]

    out_flat = pl.pallas_call(
        kernel,
        out_shape=jax.ShapeDtypeStruct((B, S, F * input_dim), jnp.float32),
        grid_spec=pltpu.PrefetchScalarGridSpec(
            num_scalar_prefetch=0,
            grid=(B,),
            in_specs=in_specs,
            out_specs=pl.BlockSpec((None, S, F * input_dim), lambda b: (b, 0, 0)),
        ),
        compiler_params=pltpu.CompilerParams(dimension_semantics=("parallel",)),
    )(
        x, wqkv, bqkv,
        params["wsq"].T, params["bsq"].reshape(1, -1),
        params["gsq"].reshape(1, -1), params["bsq_ln"].reshape(1, -1),
        params["wex"].T, params["bex"].reshape(1, -1),
        params["gex"].reshape(1, -1), params["bex_ln"].reshape(1, -1),
        params["wfc"].T, params["bfc"].reshape(1, -1),
        params["gout"].reshape(1, -1), params["bout_ln"].reshape(1, -1),
    )
    return out_flat.reshape(B, S, F, input_dim)


# --------------------------------------------------------------------------------------
# StateSpaceModel stack + merge kernel (all SSM modules fused, one batch element per step)
# --------------------------------------------------------------------------------------
def _ssm_merge_kernel(num_modules, num_layers, output_dim, num_features,
                      ax_ref, sinit_ref,
                      wcomb_ref, bcomb_ref,
                      wtrans_ref, btrans_ref, glnt_ref, blnt_ref,
                      woutl_ref, boutl_ref,
                      wobs0_ref, bobs0_ref, gobs0_ref, beobs0_ref,
                      wobsm_ref, bobsm_ref, gobsm_ref, beobsm_ref,
                      wobsf_ref, bobsf_ref,
                      wmerge_ref, bmerge_ref,
                      obs_ref, states_ref):
    M, L, OD, F = num_modules, num_layers, output_dim, num_features
    ax = ax_ref[...]                                                     # (F == 8, input_dim == OD)

    def flatten_rows(mat):
        # (R, C) -> (1, R*C), row-major == torch .view(-1)
        return jnp.concatenate([mat[r:r + 1, :] for r in range(mat.shape[0])], axis=-1)

    obs_acc = None
    for mdl in range(M):
        # combine([state_init, attended_x]) -> state matrix (OD, OD)
        comb = jnp.concatenate([sinit_ref[mdl], ax], axis=-1)            # (8, 2*OD)
        state = jnp.dot(comb, wcomb_ref[mdl],
                        preferred_element_type=jnp.float32) + bcomb_ref[mdl]     # (8, OD)
        sflat = flatten_rows(state)                                      # (1, 8*OD)
        st = jnp.dot(sflat, wtrans_ref[mdl],
                     preferred_element_type=jnp.float32) + btrans_ref[mdl]       # (1, hidden)
        st = _layer_norm(_gelu(st), glnt_ref[mdl], blnt_ref[mdl])
        so = jnp.dot(st, woutl_ref[mdl],
                     preferred_element_type=jnp.float32) + boutl_ref[mdl]        # (1, OD*OD)
        state_mat = jnp.concatenate(
            [so[:, r * OD:(r + 1) * OD] for r in range(OD)], axis=0)     # (OD, OD)
        states_ref[mdl] = state_mat

        # observation MLP applied along the last dim of the state matrix
        h = jnp.dot(state_mat, wobs0_ref[mdl],
                    preferred_element_type=jnp.float32) + bobs0_ref[mdl]
        h = _gelu(_layer_norm(h, gobs0_ref[mdl], beobs0_ref[mdl]))
        for layer in range(L - 1):
            idx = mdl * (L - 1) + layer
            h = jnp.dot(h, wobsm_ref[idx],
                        preferred_element_type=jnp.float32) + bobsm_ref[idx]
            h = _gelu(_layer_norm(h, gobsm_ref[idx], beobsm_ref[idx]))
        obs = jnp.dot(h, wobsf_ref[mdl],
                      preferred_element_type=jnp.float32) + bobsf_ref[mdl]       # (OD, OD)
        obs_acc = obs if obs_acc is None else obs_acc + obs

    obs_mean = obs_acc * (1.0 / float(M))                                # (OD, OD)
    obs_flat = flatten_rows(obs_mean)                                    # (1, F*OD)
    obs_ref[...] = jnp.dot(obs_flat, wmerge_ref[...],
                           preferred_element_type=jnp.float32) + bmerge_ref[...]  # (1, OD)


def atssm_forward(x, params, *, hidden_dim, num_heads, output_dim,
                  num_ssm_modules, num_ssm_layers):
    B, S, F = x.shape
    input_dim = F
    # The PyTorch AtSSM forward only type-checks when seq_len == 1, num_features == 8 and
    # input_dim == output_dim == 8 (torch.cat with the (B,1,8,out) state + the .view chain).
    assert S == 1 and F == 8 and output_dim == input_dim, "unsupported AtSSM shape configuration"

    attended = attention_module_forward(x, params["attention"],
                                        num_heads=num_heads, hidden_dim=hidden_dim)  # (B,1,F,in)
    ax3 = attended.reshape(B, F, input_dim)

    M, L, OD, HID = num_ssm_modules, num_ssm_layers, output_dim, hidden_dim
    ssm = params["ssm"]

    def stk(fn):
        return jnp.stack([fn(sp) for sp in ssm], axis=0)

    sinit_all = stk(lambda sp: sp["state_init"].reshape(8, OD))          # (M, 8, OD)
    wcomb_all = stk(lambda sp: sp["w_comb"].T)                           # (M, 2*OD, OD)
    bcomb_all = stk(lambda sp: sp["b_comb"].reshape(1, -1))
    wtrans_all = stk(lambda sp: sp["w_trans"].T)                         # (M, OD*OD, HID)
    btrans_all = stk(lambda sp: sp["b_trans"].reshape(1, -1))
    glnt_all = stk(lambda sp: sp["g_lnt"].reshape(1, -1))
    blnt_all = stk(lambda sp: sp["b_lnt"].reshape(1, -1))
    woutl_all = stk(lambda sp: sp["w_outl"].T)                           # (M, HID, OD*OD)
    boutl_all = stk(lambda sp: sp["b_outl"].reshape(1, -1))
    wobs0_all = stk(lambda sp: sp["w_obs0"].T)                           # (M, OD, HID)
    bobs0_all = stk(lambda sp: sp["b_obs0"].reshape(1, -1))
    gobs0_all = stk(lambda sp: sp["g_obs0"].reshape(1, -1))
    beobs0_all = stk(lambda sp: sp["be_obs0"].reshape(1, -1))
    if L > 1:
        wobsm_all = jnp.concatenate([jnp.swapaxes(sp["w_obsm"], 1, 2) for sp in ssm], axis=0)
        bobsm_all = jnp.concatenate([sp["b_obsm"][:, None, :] for sp in ssm], axis=0)
        gobsm_all = jnp.concatenate([sp["g_obsm"][:, None, :] for sp in ssm], axis=0)
        beobsm_all = jnp.concatenate([sp["be_obsm"][:, None, :] for sp in ssm], axis=0)
    else:  # unused dummies so the arg list stays fixed
        wobsm_all = jnp.zeros((1, HID, HID), jnp.float32)
        bobsm_all = jnp.zeros((1, 1, HID), jnp.float32)
        gobsm_all = jnp.zeros((1, 1, HID), jnp.float32)
        beobsm_all = jnp.zeros((1, 1, HID), jnp.float32)
    wobsf_all = stk(lambda sp: sp["w_obsf"].T)                           # (M, HID, OD)
    bobsf_all = stk(lambda sp: sp["b_obsf"].reshape(1, -1))
    wmerge = params["w_merge"].T                                         # (F*OD, OD)
    bmerge = params["b_merge"].reshape(1, -1)

    weights = [sinit_all, wcomb_all, bcomb_all, wtrans_all, btrans_all, glnt_all, blnt_all,
               woutl_all, boutl_all, wobs0_all, bobs0_all, gobs0_all, beobs0_all,
               wobsm_all, bobsm_all, gobsm_all, beobsm_all, wobsf_all, bobsf_all,
               wmerge, bmerge]

    def full_spec(a):
        n = a.ndim
        return pl.BlockSpec(a.shape, lambda b, _n=n: (0,) * _n)

    in_specs = [pl.BlockSpec((None, F, input_dim), lambda b: (b, 0, 0))] \
        + [full_spec(w) for w in weights]

    kernel = functools.partial(_ssm_merge_kernel, M, L, OD, F)

    obs, states = pl.pallas_call(
        kernel,
        out_shape=(jax.ShapeDtypeStruct((B, 1, OD), jnp.float32),
                   jax.ShapeDtypeStruct((B, M, OD, OD), jnp.float32)),
        grid_spec=pltpu.PrefetchScalarGridSpec(
            num_scalar_prefetch=0,
            grid=(B,),
            in_specs=in_specs,
            out_specs=[pl.BlockSpec((None, 1, OD), lambda b: (b, 0, 0)),
                       pl.BlockSpec((None, M, OD, OD), lambda b: (b, 0, 0, 0))],
        ),
        compiler_params=pltpu.CompilerParams(dimension_semantics=("parallel",)),
    )(ax3, *weights)

    new_states = [states[:, m].reshape(B, 1, OD, OD) for m in range(M)]
    return obs, new_states


# --------------------------------------------------------------------------------------
# pure-JAX reference (mirrors the PyTorch forward) + parameter init
# --------------------------------------------------------------------------------------
def _ref_attention(x, p, *, num_heads, hidden_dim):
    B, S, F = x.shape
    H, D = num_heads, hidden_dim

    def lin(y, w, b):
        return jnp.einsum("...i,oi->...o", y, w, precision="highest") + b

    q = lin(x, p["wq"], p["bq"]).reshape(B, S, F, H, D).swapaxes(2, 3)
    k = lin(x, p["wk"], p["bk"]).reshape(B, S, F, H, D).swapaxes(2, 3)
    v = lin(x, p["wv"], p["bv"]).reshape(B, S, F, H, D).swapaxes(2, 3)
    e = jnp.einsum("bqchd,bkchd->bhqck", q, k, precision="highest")
    a = jax.nn.softmax(e / (D ** 0.5), axis=-1)
    t = jnp.einsum("bhqck,bkchd->bqchd", a, v, precision="highest")
    t = t.swapaxes(2, 3).reshape(B, S, F, H * D)
    ss = t.mean(axis=1).reshape(B, -1)
    z1 = _layer_norm(lin(ss, p["wsq"], p["bsq"]), p["gsq"], p["bsq_ln"])
    z2 = _layer_norm(lin(z1, p["wex"], p["bex"]), p["gex"], p["bex_ln"])
    exc = jax.nn.sigmoid(z2).reshape(B, 1, F, H * D)
    sp = t * exc
    return _layer_norm(lin(sp, p["wfc"], p["bfc"]), p["gout"], p["bout_ln"])


def _ref_ssm(ax, sp, *, output_dim, num_layers):
    B = ax.shape[0]
    OD = output_dim

    def lin(y, w, b):
        return jnp.einsum("...i,oi->...o", y, w, precision="highest") + b

    s_init = jnp.broadcast_to(sp["state_init"], (B,) + sp["state_init"].shape[1:])
    comb = jnp.concatenate([s_init, ax], axis=-1)
    state = lin(comb.reshape(-1, 2 * OD), sp["w_comb"], sp["b_comb"]).reshape(B, 1, OD, OD)
    st = lin(state.reshape(B, 1, -1), sp["w_trans"], sp["b_trans"])
    st = _layer_norm(_gelu(st), sp["g_lnt"], sp["b_lnt"])
    state = lin(st, sp["w_outl"], sp["b_outl"]).reshape(B, 1, OD, OD)
    h = _gelu(_layer_norm(lin(state, sp["w_obs0"], sp["b_obs0"]), sp["g_obs0"], sp["be_obs0"]))
    for l in range(num_layers - 1):
        h = _gelu(_layer_norm(lin(h, sp["w_obsm"][l], sp["b_obsm"][l]),
                              sp["g_obsm"][l], sp["be_obsm"][l]))
    obs = lin(h, sp["w_obsf"], sp["b_obsf"])
    return obs, state


def _ref_atssm(x, params, *, num_heads, hidden_dim, output_dim, num_ssm_layers):
    ax = _ref_attention(x, params["attention"], num_heads=num_heads, hidden_dim=hidden_dim)
    obs_list, states = [], []
    for sp in params["ssm"]:
        o, s = _ref_ssm(ax, sp, output_dim=output_dim, num_layers=num_ssm_layers)
        obs_list.append(o)
        states.append(s)
    obs = jnp.stack(obs_list).mean(axis=0)
    obs = obs.reshape(obs.shape[0], obs.shape[1], -1)
    merged = jnp.einsum("...i,oi->...o", obs, params["w_merge"],
                        precision="highest") + params["b_merge"]
    return merged, states


def _uniform_linear(key, out_dim, in_dim):
    kw, kb = jax.random.split(key)
    s = 1.0 / (in_dim ** 0.5)
    w = jax.random.uniform(kw, (out_dim, in_dim), jnp.float32, -s, s)
    b = jax.random.uniform(kb, (out_dim,), jnp.float32, -s, s)
    return w, b


def _init_attention_params(key, input_dim, hidden_dim, num_heads, num_features):
    FHD = hidden_dim * num_heads * num_features
    HH2 = hidden_dim * num_heads // 2
    HD = hidden_dim * num_heads
    keys = jax.random.split(key, 16)
    p = {}
    p["wq"], p["bq"] = _uniform_linear(keys[0], FHD, input_dim)
    p["wk"], p["bk"] = _uniform_linear(keys[1], FHD, input_dim)
    p["wv"], p["bv"] = _uniform_linear(keys[2], FHD, input_dim)
    p["wsq"], p["bsq"] = _uniform_linear(keys[3], HH2, FHD)
    p["wex"], p["bex"] = _uniform_linear(keys[4], FHD, HH2)
    p["wfc"], p["bfc"] = _uniform_linear(keys[5], input_dim, HD)
    p["gsq"] = 1.0 + 0.1 * jax.random.normal(keys[6], (HH2,), jnp.float32)
    p["bsq_ln"] = 0.1 * jax.random.normal(keys[7], (HH2,), jnp.float32)
    p["gex"] = 1.0 + 0.1 * jax.random.normal(keys[8], (FHD,), jnp.float32)
    p["bex_ln"] = 0.1 * jax.random.normal(keys[9], (FHD,), jnp.float32)
    p["gout"] = 1.0 + 0.1 * jax.random.normal(keys[10], (input_dim,), jnp.float32)
    p["bout_ln"] = 0.1 * jax.random.normal(keys[11], (input_dim,), jnp.float32)
    return p


def _init_ssm_params(key, input_dim, hidden_dim, output_dim, num_layers):
    n_mid = num_layers - 1
    kit = iter(jax.random.split(key, 16 + 4 * max(n_mid, 1)))
    p = {}
    p["w_comb"], p["b_comb"] = _uniform_linear(next(kit), input_dim, input_dim * 2)
    p["w_trans"], p["b_trans"] = _uniform_linear(next(kit), hidden_dim, output_dim * output_dim)
    p["g_lnt"] = 1.0 + 0.1 * jax.random.normal(next(kit), (hidden_dim,), jnp.float32)
    p["b_lnt"] = 0.1 * jax.random.normal(next(kit), (hidden_dim,), jnp.float32)
    p["w_outl"], p["b_outl"] = _uniform_linear(next(kit), output_dim * output_dim, hidden_dim)
    p["state_init"] = 0.1 * jax.random.normal(next(kit), (1, 1, 8, output_dim), jnp.float32)
    p["w_obs0"], p["b_obs0"] = _uniform_linear(next(kit), hidden_dim, input_dim)
    p["g_obs0"] = 1.0 + 0.1 * jax.random.normal(next(kit), (hidden_dim,), jnp.float32)
    p["be_obs0"] = 0.1 * jax.random.normal(next(kit), (hidden_dim,), jnp.float32)
    wms, bms, gms, bems = [], [], [], []
    for _ in range(n_mid):
        w, b = _uniform_linear(next(kit), hidden_dim, hidden_dim)
        wms.append(w)
        bms.append(b)
        gms.append(1.0 + 0.1 * jax.random.normal(next(kit), (hidden_dim,), jnp.float32))
        bems.append(0.1 * jax.random.normal(next(kit), (hidden_dim,), jnp.float32))
    p["w_obsm"] = jnp.stack(wms) if n_mid > 0 else jnp.zeros((0, hidden_dim, hidden_dim), jnp.float32)
    p["b_obsm"] = jnp.stack(bms) if n_mid > 0 else jnp.zeros((0, hidden_dim), jnp.float32)
    p["g_obsm"] = jnp.stack(gms) if n_mid > 0 else jnp.zeros((0, hidden_dim), jnp.float32)
    p["be_obsm"] = jnp.stack(bems) if n_mid > 0 else jnp.zeros((0, hidden_dim), jnp.float32)
    p["w_obsf"], p["b_obsf"] = _uniform_linear(next(kit), output_dim, hidden_dim)
    return p


def _init_atssm_params(key, *, input_dim, hidden_dim, output_dim, num_heads,
                       num_ssm_modules, num_ssm_layers, num_features):
    keys = jax.random.split(key, 2 + num_ssm_modules)
    p = {"attention": _init_attention_params(keys[0], input_dim, hidden_dim, num_heads, num_features)}
    p["ssm"] = [_init_ssm_params(keys[1 + m], input_dim, hidden_dim, output_dim, num_ssm_layers)
                for m in range(num_ssm_modules)]
    p["w_merge"], p["b_merge"] = _uniform_linear(keys[-1], output_dim, num_features * output_dim)
    return p


if __name__ == "__main__":
    key = jax.random.PRNGKey(0)
    k_x, k_p, k_x2, k_p2 = jax.random.split(key, 4)

    # ---- 1) standalone AttentionModule check at a more general shape (S > 1) ----
    batch_a, seq_a, feat_a = 2, 8, 4
    hidden_a, heads_a = 8, 2
    x_a = jax.random.normal(k_x, (batch_a, seq_a, feat_a), jnp.float32)
    p_a = _init_attention_params(k_p, feat_a, hidden_a, heads_a, feat_a)
    out_a = jax.block_until_ready(
        attention_module_forward(x_a, p_a, num_heads=heads_a, hidden_dim=hidden_a))
    ref_a = _ref_attention(x_a, p_a, num_heads=heads_a, hidden_dim=hidden_a)
    assert out_a.shape == (batch_a, seq_a, feat_a, feat_a)
    assert bool(jnp.allclose(out_a, ref_a, rtol=2e-2, atol=2e-2)), "attention mismatch vs reference"

    # ---- 2) full AtSSMModel forward (shapes forced by the PyTorch module's .cat/.view chain) ----
    batch = 2
    seq_len, num_features, input_dim, output_dim = 1, 8, 8, 8
    hidden_dim, num_heads = 16, 2
    num_ssm_modules, num_ssm_layers = 2, 2

    x = jax.random.normal(k_x2, (batch, seq_len, num_features), jnp.float32)
    params = _init_atssm_params(k_p2, input_dim=input_dim, hidden_dim=hidden_dim,
                                output_dim=output_dim, num_heads=num_heads,
                                num_ssm_modules=num_ssm_modules, num_ssm_layers=num_ssm_layers,
                                num_features=num_features)

    obs, new_states = atssm_forward(x, params, hidden_dim=hidden_dim, num_heads=num_heads,
                                    output_dim=output_dim, num_ssm_modules=num_ssm_modules,
                                    num_ssm_layers=num_ssm_layers)
    jax.block_until_ready((obs, new_states))

    ref_obs, ref_states = _ref_atssm(x, params, num_heads=num_heads, hidden_dim=hidden_dim,
                                     output_dim=output_dim, num_ssm_layers=num_ssm_layers)
    assert obs.shape == (batch, 1, output_dim)
    assert bool(jnp.allclose(obs, ref_obs, rtol=2e-2, atol=2e-2)), "observation mismatch vs reference"
    for s_k, s_r in zip(new_states, ref_states):
        assert s_k.shape == (batch, 1, output_dim, output_dim)
        assert bool(jnp.allclose(s_k, s_r, rtol=2e-2, atol=2e-2)), "state mismatch vs reference"

    print("KERNEL_OK")
</pallas_src>

<mosaic_0001>
module attributes {stable_mosaic.version = 11 : i64} {
  func.func @_attention_kernel(%arg0: i32, %arg1: memref<1x8x4xf32, #tpu.memory_space<vmem>>, %arg2: memref<4x192xf32, #tpu.memory_space<vmem>>, %arg3: memref<1x192xf32, #tpu.memory_space<vmem>>, %arg4: memref<64x8xf32, #tpu.memory_space<vmem>>, %arg5: memref<1x8xf32, #tpu.memory_space<vmem>>, %arg6: memref<1x8xf32, #tpu.memory_space<vmem>>, %arg7: memref<1x8xf32, #tpu.memory_space<vmem>>, %arg8: memref<8x64xf32, #tpu.memory_space<vmem>>, %arg9: memref<1x64xf32, #tpu.memory_space<vmem>>, %arg10: memref<1x64xf32, #tpu.memory_space<vmem>>, %arg11: memref<1x64xf32, #tpu.memory_space<vmem>>, %arg12: memref<16x4xf32, #tpu.memory_space<vmem>>, %arg13: memref<1x4xf32, #tpu.memory_space<vmem>>, %arg14: memref<1x4xf32, #tpu.memory_space<vmem>>, %arg15: memref<1x4xf32, #tpu.memory_space<vmem>>, %arg16: memref<1x8x16xf32, #tpu.memory_space<vmem>>) attributes {dimension_semantics = [#tpu.dimension_semantics<parallel>], iteration_bounds = array<i64: 2>, scalar_prefetch = 0 : i64, scratch_operands = 0 : i64, tpu.core_type = #tpu.core_type<tc>, window_params = [{transform_indices = @transform_0, window_bounds = array<i64: 1, 8, 4>}, {pipeline_mode = #tpu.pipeline_mode<synchronous>, transform_indices = @transform_1, window_bounds = array<i64: 4, 192>}, {pipeline_mode = #tpu.pipeline_mode<synchronous>, transform_indices = @transform_2, window_bounds = array<i64: 1, 192>}, {pipeline_mode = #tpu.pipeline_mode<synchronous>, transform_indices = @transform_3, window_bounds = array<i64: 64, 8>}, {pipeline_mode = #tpu.pipeline_mode<synchronous>, transform_indices = @transform_4, window_bounds = array<i64: 1, 8>}, {pipeline_mode = #tpu.pipeline_mode<synchronous>, transform_indices = @transform_5, window_bounds = array<i64: 1, 8>}, {pipeline_mode = #tpu.pipeline_mode<synchronous>, transform_indices = @transform_6, window_bounds = array<i64: 1, 8>}, {pipeline_mode = #tpu.pipeline_mode<synchronous>, transform_indices = @transform_7, window_bounds = array<i64: 8, 64>}, {pipeline_mode = #tpu.pipeline_mode<synchronous>, transform_indices = @transform_8, window_bounds = array<i64: 1, 64>}, {pipeline_mode = #tpu.pipeline_mode<synchronous>, transform_indices = @transform_9, window_bounds = array<i64: 1, 64>}, {pipeline_mode = #tpu.pipeline_mode<synchronous>, transform_indices = @transform_10, window_bounds = array<i64: 1, 64>}, {pipeline_mode = #tpu.pipeline_mode<synchronous>, transform_indices = @transform_11, window_bounds = array<i64: 16, 4>}, {pipeline_mode = #tpu.pipeline_mode<synchronous>, transform_indices = @transform_12, window_bounds = array<i64: 1, 4>}, {pipeline_mode = #tpu.pipeline_mode<synchronous>, transform_indices = @transform_13, window_bounds = array<i64: 1, 4>}, {pipeline_mode = #tpu.pipeline_mode<synchronous>, transform_indices = @transform_14, window_bounds = array<i64: 1, 4>}, {transform_indices = @transform_15, window_bounds = array<i64: 1, 8, 16>}]} {
    %c0 = arith.constant 0 : index
    %c0_0 = arith.constant 0 : index
    %c0_1 = arith.constant 0 : index
    %0 = vector.load %arg1[%c0, %c0_0, %c0_1] : memref<1x8x4xf32, #tpu.memory_space<vmem>>, vector<1x8x4xf32>
    %1 = vector.shape_cast %0 : vector<1x8x4xf32> to vector<8x4xf32>
    %c0_2 = arith.constant 0 : index
    %c0_3 = arith.constant 0 : index
    %2 = vector.load %arg2[%c0_2, %c0_3] : memref<4x192xf32, #tpu.memory_space<vmem>>, vector<4x192xf32>
    %cst = arith.constant dense<0.000000e+00> : vector<8x192xf32>
    %3 = tpu.matmul %1, %2, %cst {dimension_numbers = #tpu.dot_dimension_numbers<[1], [0], [0], [1], [0, 0, 1, 1], [], []>} : vector<8x4xf32>, vector<4x192xf32>, vector<8x192xf32> -> vector<8x192xf32>
    %c0_4 = arith.constant 0 : index
    %c0_5 = arith.constant 0 : index
    %4 = vector.load %arg3[%c0_4, %c0_5] : memref<1x192xf32, #tpu.memory_space<vmem>>, vector<1x192xf32>
    %5 = vector.broadcast %4 : vector<1x192xf32> to vector<8x192xf32>
    %6 = arith.addf %3, %5 : vector<8x192xf32>
    %7 = vector.extract_strided_slice %6 {offsets = [0, 0], sizes = [8, 64], strides = [1, 1]} : vector<8x192xf32> to vector<8x64xf32>
    %8 = vector.extract_strided_slice %6 {offsets = [0, 64], sizes = [8, 64], strides = [1, 1]} : vector<8x192xf32> to vector<8x64xf32>
    %9 = vector.extract_strided_slice %6 {offsets = [0, 128], sizes = [8, 64], strides = [1, 1]} : vector<8x192xf32> to vector<8x64xf32>
    %10 = vector.extract_strided_slice %7 {offsets = [0, 0], sizes = [8, 8], strides = [1, 1]} : vector<8x64xf32> to vector<8x8xf32>
    %11 = vector.extract_strided_slice %7 {offsets = [0, 8], sizes = [8, 8], strides = [1, 1]} : vector<8x64xf32> to vector<8x8xf32>
    %12 = vector.extract_strided_slice %7 {offsets = [0, 16], sizes = [8, 8], strides = [1, 1]} : vector<8x64xf32> to vector<8x8xf32>
    %13 = vector.extract_strided_slice %7 {offsets = [0, 24], sizes = [8, 8], strides = [1, 1]} : vector<8x64xf32> to vector<8x8xf32>
    %14 = vector.extract_strided_slice %7 {offsets = [0, 32], sizes = [8, 8], strides = [1, 1]} : vector<8x64xf32> to vector<8x8xf32>
    %15 = vector.extract_strided_slice %7 {offsets = [0, 40], sizes = [8, 8], strides = [1, 1]} : vector<8x64xf32> to vector<8x8xf32>
    %16 = vector.extract_strided_slice %7 {offsets = [0, 48], sizes = [8, 8], strides = [1, 1]} : vector<8x64xf32> to vector<8x8xf32>
    %17 = vector.extract_strided_slice %7 {offsets = [0, 56], sizes = [8, 8], strides = [1, 1]} : vector<8x64xf32> to vector<8x8xf32>
    %18 = vector.shape_cast %10 : vector<8x8xf32> to vector<1x8x8xf32>
    %19 = vector.shape_cast %11 : vector<8x8xf32> to vector<1x8x8xf32>
    %20 = vector.shape_cast %12 : vector<8x8xf32> to vector<1x8x8xf32>
    %21 = vector.shape_cast %13 : vector<8x8xf32> to vector<1x8x8xf32>
    %22 = vector.shape_cast %14 : vector<8x8xf32> to vector<1x8x8xf32>
    %23 = vector.shape_cast %15 : vector<8x8xf32> to vector<1x8x8xf32>
    %24 = vector.shape_cast %16 : vector<8x8xf32> to vector<1x8x8xf32>
    %25 = vector.shape_cast %17 : vector<8x8xf32> to vector<1x8x8xf32>
    %26 = tpu.concatenate %18, %19, %20, %21, %22, %23, %24, %25 in 0 : vector<1x8x8xf32>, vector<1x8x8xf32>, vector<1x8x8xf32>, vector<1x8x8xf32>, vector<1x8x8xf32>, vector<1x8x8xf32>, vector<1x8x8xf32>, vector<1x8x8xf32> -> vector<8x8x8xf32>
    %27 = vector.extract_strided_slice %8 {offsets = [0, 0], sizes = [8, 8], strides = [1, 1]} : vector<8x64xf32> to vector<8x8xf32>
    %28 = vector.extract_strided_slice %8 {offsets = [0, 8], sizes = [8, 8], strides = [1, 1]} : vector<8x64xf32> to vector<8x8xf32>
    %29 = vector.extract_strided_slice %8 {offsets = [0, 16], sizes = [8, 8], strides = [1, 1]} : vector<8x64xf32> to vector<8x8xf32>
    %30 = vector.extract_strided_slice %8 {offsets = [0, 24], sizes = [8, 8], strides = [1, 1]} : vector<8x64xf32> to vector<8x8xf32>
    %31 = vector.extract_strided_slice %8 {offsets = [0, 32], sizes = [8, 8], strides = [1, 1]} : vector<8x64xf32> to vector<8x8xf32>
    %32 = vector.extract_strided_slice %8 {offsets = [0, 40], sizes = [8, 8], strides = [1, 1]} : vector<8x64xf32> to vector<8x8xf32>
    %33 = vector.extract_strided_slice %8 {offsets = [0, 48], sizes = [8, 8], strides = [1, 1]} : vector<8x64xf32> to vector<8x8xf32>
    %34 = vector.extract_strided_slice %8 {offsets = [0, 56], sizes = [8, 8], strides = [1, 1]} : vector<8x64xf32> to vector<8x8xf32>
    %35 = vector.shape_cast %27 : vector<8x8xf32> to vector<1x8x8xf32>
    %36 = vector.shape_cast %28 : vector<8x8xf32> to vector<1x8x8xf32>
    %37 = vector.shape_cast %29 : vector<8x8xf32> to vector<1x8x8xf32>
    %38 = vector.shape_cast %30 : vector<8x8xf32> to vector<1x8x8xf32>
    %39 = vector.shape_cast %31 : vector<8x8xf32> to vector<1x8x8xf32>
    %40 = vector.shape_cast %32 : vector<8x8xf32> to vector<1x8x8xf32>
    %41 = vector.shape_cast %33 : vector<8x8xf32> to vector<1x8x8xf32>
    %42 = vector.shape_cast %34 : vector<8x8xf32> to vector<1x8x8xf32>
    %43 = tpu.concatenate %35, %36, %37, %38, %39, %40, %41, %42 in 0 : vector<1x8x8xf32>, vector<1x8x8xf32>, vector<1x8x8xf32>, vector<1x8x8xf32>, vector<1x8x8xf32>, vector<1x8x8xf32>, vector<1x8x8xf32>, vector<1x8x8xf32> -> vector<8x8x8xf32>
    %44 = vector.extract_strided_slice %9 {offsets = [0, 0], sizes = [8, 8], strides = [1, 1]} : vector<8x64xf32> to vector<8x8xf32>
    %45 = vector.extract_strided_slice %9 {offsets = [0, 8], sizes = [8, 8], strides = [1, 1]} : vector<8x64xf32> to vector<8x8xf32>
    %46 = vector.extract_strided_slice %9 {offsets = [0, 16], sizes = [8, 8], strides = [1, 1]} : vector<8x64xf32> to vector<8x8xf32>
    %47 = vector.extract_strided_slice %9 {offsets = [0, 24], sizes = [8, 8], strides = [1, 1]} : vector<8x64xf32> to vector<8x8xf32>
    %48 = vector.extract_strided_slice %9 {offsets = [0, 32], sizes = [8, 8], strides = [1, 1]} : vector<8x64xf32> to vector<8x8xf32>
    %49 = vector.extract_strided_slice %9 {offsets = [0, 40], sizes = [8, 8], strides = [1, 1]} : vector<8x64xf32> to vector<8x8xf32>
    %50 = vector.extract_strided_slice %9 {offsets = [0, 48], sizes = [8, 8], strides = [1, 1]} : vector<8x64xf32> to vector<8x8xf32>
    %51 = vector.extract_strided_slice %9 {offsets = [0, 56], sizes = [8, 8], strides = [1, 1]} : vector<8x64xf32> to vector<8x8xf32>
    %52 = vector.shape_cast %44 : vector<8x8xf32> to vector<1x8x8xf32>
    %53 = vector.shape_cast %45 : vector<8x8xf32> to vector<1x8x8xf32>
    %54 = vector.shape_cast %46 : vector<8x8xf32> to vector<1x8x8xf32>
    %55 = vector.shape_cast %47 : vector<8x8xf32> to vector<1x8x8xf32>
    %56 = vector.shape_cast %48 : vector<8x8xf32> to vector<1x8x8xf32>
    %57 = vector.shape_cast %49 : vector<8x8xf32> to vector<1x8x8xf32>
    %58 = vector.shape_cast %50 : vector<8x8xf32> to vector<1x8x8xf32>
    %59 = vector.shape_cast %51 : vector<8x8xf32> to vector<1x8x8xf32>
    %60 = tpu.concatenate %52, %53, %54, %55, %56, %57, %58, %59 in 0 : vector<1x8x8xf32>, vector<1x8x8xf32>, vector<1x8x8xf32>, vector<1x8x8xf32>, vector<1x8x8xf32>, vector<1x8x8xf32>, vector<1x8x8xf32>, vector<1x8x8xf32> -> vector<8x8x8xf32>
    %cst_6 = arith.constant dense<0.000000e+00> : vector<8x8x8xf32>
    %61 = tpu.matmul %26, %43, %cst_6 {dimension_numbers = #tpu.dot_dimension_numbers<[2], [2], [1], [1], [0, 0, 0, 1, 1, 1], [0], [0]>} : vector<8x8x8xf32>, vector<8x8x8xf32>, vector<8x8x8xf32> -> vector<8x8x8xf32>
    %cst_7 = arith.constant 0.353553385 : f32
    %62 = vector.broadcast %cst_7 : f32 to vector<8x8x8xf32>
    %63 = arith.mulf %61, %62 : vector<8x8x8xf32>
    %cst_8 = arith.constant dense<0xFF800000> : vector<8x8xf32>
    %64 = vector.multi_reduction <maximumf>, %63, %cst_8 [2] : vector<8x8x8xf32> to vector<8x8xf32>
    %65 = vector.shape_cast %64 : vector<8x8xf32> to vector<8x8x1xf32>
    %66 = vector.broadcast %65 : vector<8x8x1xf32> to vector<8x8x8xf32>
    %67 = arith.subf %63, %66 : vector<8x8x8xf32>
    %68 = math.exp %67 : vector<8x8x8xf32>
    %cst_9 = arith.constant dense<0.000000e+00> : vector<8x8xf32>
    %69 = vector.multi_reduction <add>, %68, %cst_9 [2] : vector<8x8x8xf32> to vector<8x8xf32>
    %70 = vector.shape_cast %69 : vector<8x8xf32> to vector<8x8x1xf32>
    %71 = tpu.reciprocal %70 {approx = true} : vector<8x8x1xf32> -> vector<8x8x1xf32>
    %72 = vector.broadcast %71 : vector<8x8x1xf32> to vector<8x8x8xf32>
    %73 = arith.mulf %68, %72 : vector<8x8x8xf32>
    %cst_10 = arith.constant dense<0.000000e+00> : vector<8x8x8xf32>
    %74 = tpu.matmul %73, %60, %cst_10 {dimension_numbers = #tpu.dot_dimension_numbers<[2], [1], [1], [2], [0, 0, 0, 1, 1, 2], [0], [0]>} : vector<8x8x8xf32>, vector<8x8x8xf32>, vector<8x8x8xf32> -> vector<8x8x8xf32>
    %75 = vector.extract_strided_slice %74 {offsets = [0, 0, 0], sizes = [1, 8, 8], strides = [1, 1, 1]} : vector<8x8x8xf32> to vector<1x8x8xf32>
    %76 = vector.shape_cast %75 : vector<1x8x8xf32> to vector<8x8xf32>
    %77 = vector.extract_strided_slice %74 {offsets = [1, 0, 0], sizes = [1, 8, 8], strides = [1, 1, 1]} : vector<8x8x8xf32> to vector<1x8x8xf32>
    %78 = vector.shape_cast %77 : vector<1x8x8xf32> to vector<8x8xf32>
    %79 = vector.extract_strided_slice %74 {offsets = [2, 0, 0], sizes = [1, 8, 8], strides = [1, 1, 1]} : vector<8x8x8xf32> to vector<1x8x8xf32>
    %80 = vector.shape_cast %79 : vector<1x8x8xf32> to vector<8x8xf32>
    %81 = vector.extract_strided_slice %74 {offsets = [3, 0, 0], sizes = [1, 8, 8], strides = [1, 1, 1]} : vector<8x8x8xf32> to vector<1x8x8xf32>
    %82 = vector.shape_cast %81 : vector<1x8x8xf32> to vector<8x8xf32>
    %83 = vector.extract_strided_slice %74 {offsets = [4, 0, 0], sizes = [1, 8, 8], strides = [1, 1, 1]} : vector<8x8x8xf32> to vector<1x8x8xf32>
    %84 = vector.shape_cast %83 : vector<1x8x8xf32> to vector<8x8xf32>
    %85 = vector.extract_strided_slice %74 {offsets = [5, 0, 0], sizes = [1, 8, 8], strides = [1, 1, 1]} : vector<8x8x8xf32> to vector<1x8x8xf32>
    %86 = vector.shape_cast %85 : vector<1x8x8xf32> to vector<8x8xf32>
    %87 = vector.extract_strided_slice %74 {offsets = [6, 0, 0], sizes = [1, 8, 8], strides = [1, 1, 1]} : vector<8x8x8xf32> to vector<1x8x8xf32>
    %88 = vector.shape_cast %87 : vector<1x8x8xf32> to vector<8x8xf32>
    %89 = vector.extract_strided_slice %74 {offsets = [7, 0, 0], sizes = [1, 8, 8], strides = [1, 1, 1]} : vector<8x8x8xf32> to vector<1x8x8xf32>
    %90 = vector.shape_cast %89 : vector<1x8x8xf32> to vector<8x8xf32>
    %91 = tpu.concatenate %76, %78, %80, %82, %84, %86, %88, %90 in 1 : vector<8x8xf32>, vector<8x8xf32>, vector<8x8xf32>, vector<8x8xf32>, vector<8x8xf32>, vector<8x8xf32>, vector<8x8xf32>, vector<8x8xf32> -> vector<8x64xf32>
    %cst_11 = arith.constant dense<0.000000e+00> : vector<64xf32>
    %92 = vector.multi_reduction <add>, %91, %cst_11 [0] : vector<8x64xf32> to vector<64xf32>
    %93 = vector.shape_cast %92 : vector<64xf32> to vector<1x64xf32>
    %cst_12 = arith.constant 8.000000e+00 : f32
    %94 = vector.broadcast %cst_12 : f32 to vector<1x64xf32>
    %95 = arith.divf %93, %94 : vector<1x64xf32>
    %c0_13 = arith.constant 0 : index
    %c0_14 = arith.constant 0 : index
    %96 = vector.load %arg4[%c0_13, %c0_14] : memref<64x8xf32, #tpu.memory_space<vmem>>, vector<64x8xf32>
    %cst_15 = arith.constant dense<0.000000e+00> : vector<1x8xf32>
    %97 = tpu.matmul %95, %96, %cst_15 {dimension_numbers = #tpu.dot_dimension_numbers<[1], [0], [0], [1], [0, 0, 1, 1], [], []>} : vector<1x64xf32>, vector<64x8xf32>, vector<1x8xf32> -> vector<1x8xf32>
    %c0_16 = arith.constant 0 : index
    %c0_17 = arith.constant 0 : index
    %98 = vector.load %arg5[%c0_16, %c0_17] : memref<1x8xf32, #tpu.memory_space<vmem>>, vector<1x8xf32>
    %99 = arith.addf %97, %98 : vector<1x8xf32>
    %c0_18 = arith.constant 0 : index
    %c0_19 = arith.constant 0 : index
    %100 = vector.load %arg6[%c0_18, %c0_19] : memref<1x8xf32, #tpu.memory_space<vmem>>, vector<1x8xf32>
    %c0_20 = arith.constant 0 : index
    %c0_21 = arith.constant 0 : index
    %101 = vector.load %arg7[%c0_20, %c0_21] : memref<1x8xf32, #tpu.memory_space<vmem>>, vector<1x8xf32>
    %cst_22 = arith.constant dense<0.000000e+00> : vector<1xf32>
    %102 = vector.multi_reduction <add>, %99, %cst_22 [1] : vector<1x8xf32> to vector<1xf32>
    %103 = vector.shape_cast %102 : vector<1xf32> to vector<1x1xf32>
    %cst_23 = arith.constant 8.000000e+00 : f32
    %104 = vector.broadcast %cst_23 : f32 to vector<1x1xf32>
    %105 = arith.divf %103, %104 : vector<1x1xf32>
    %106 = vector.broadcast %105 : vector<1x1xf32> to vector<1x8xf32>
    %107 = arith.subf %99, %106 : vector<1x8xf32>
    %108 = arith.mulf %107, %107 : vector<1x8xf32>
    %cst_24 = arith.constant dense<0.000000e+00> : vector<1xf32>
    %109 = vector.multi_reduction <add>, %108, %cst_24 [1] : vector<1x8xf32> to vector<1xf32>
    %110 = vector.shape_cast %109 : vector<1xf32> to vector<1x1xf32>
    %cst_25 = arith.constant 8.000000e+00 : f32
    %111 = vector.broadcast %cst_25 : f32 to vector<1x1xf32>
    %112 = arith.divf %110, %111 : vector<1x1xf32>
    %113 = vector.broadcast %105 : vector<1x1xf32> to vector<1x8xf32>
    %114 = arith.subf %99, %113 : vector<1x8xf32>
    %cst_26 = arith.constant 9.99999974E-6 : f32
    %115 = vector.broadcast %cst_26 : f32 to vector<1x1xf32>
    %116 = arith.addf %112, %115 : vector<1x1xf32>
    %117 = math.rsqrt %116 : vector<1x1xf32>
    %118 = vector.broadcast %117 : vector<1x1xf32> to vector<1x8xf32>
    %119 = arith.mulf %114, %118 : vector<1x8xf32>
    %120 = arith.mulf %119, %100 : vector<1x8xf32>
    %121 = arith.addf %120, %101 : vector<1x8xf32>
    %c0_27 = arith.constant 0 : index
    %c0_28 = arith.constant 0 : index
    %122 = vector.load %arg8[%c0_27, %c0_28] : memref<8x64xf32, #tpu.memory_space<vmem>>, vector<8x64xf32>
    %cst_29 = arith.constant dense<0.000000e+00> : vector<1x64xf32>
    %123 = tpu.matmul %121, %122, %cst_29 {dimension_numbers = #tpu.dot_dimension_numbers<[1], [0], [0], [1], [0, 0, 1, 1], [], []>} : vector<1x8xf32>, vector<8x64xf32>, vector<1x64xf32> -> vector<1x64xf32>
    %c0_30 = arith.constant 0 : index
    %c0_31 = arith.constant 0 : index
    %124 = vector.load %arg9[%c0_30, %c0_31] : memref<1x64xf32, #tpu.memory_space<vmem>>, vector<1x64xf32>
    %125 = arith.addf %123, %124 : vector<1x64xf32>
    %c0_32 = arith.constant 0 : index
    %c0_33 = arith.constant 0 : index
    %126 = vector.load %arg10[%c0_32, %c0_33] : memref<1x64xf32, #tpu.memory_space<vmem>>, vector<1x64xf32>
    %c0_34 = arith.constant 0 : index
    %c0_35 = arith.constant 0 : index
    %127 = vector.load %arg11[%c0_34, %c0_35] : memref<1x64xf32, #tpu.memory_space<vmem>>, vector<1x64xf32>
    %cst_36 = arith.constant dense<0.000000e+00> : vector<1xf32>
    %128 = vector.multi_reduction <add>, %125, %cst_36 [1] : vector<1x64xf32> to vector<1xf32>
    %129 = vector.shape_cast %128 : vector<1xf32> to vector<1x1xf32>
    %cst_37 = arith.constant 6.400000e+01 : f32
    %130 = vector.broadcast %cst_37 : f32 to vector<1x1xf32>
    %131 = arith.divf %129, %130 : vector<1x1xf32>
    %132 = vector.broadcast %131 : vector<1x1xf32> to vector<1x64xf32>
    %133 = arith.subf %125, %132 : vector<1x64xf32>
    %134 = arith.mulf %133, %133 : vector<1x64xf32>
    %cst_38 = arith.constant dense<0.000000e+00> : vector<1xf32>
    %135 = vector.multi_reduction <add>, %134, %cst_38 [1] : vector<1x64xf32> to vector<1xf32>
    %136 = vector.shape_cast %135 : vector<1xf32> to vector<1x1xf32>
    %cst_39 = arith.constant 6.400000e+01 : f32
    %137 = vector.broadcast %cst_39 : f32 to vector<1x1xf32>
    %138 = arith.divf %136, %137 : vector<1x1xf32>
    %139 = vector.broadcast %131 : vector<1x1xf32> to vector<1x64xf32>
    %140 = arith.subf %125, %139 : vector<1x64xf32>
    %cst_40 = arith.constant 9.99999974E-6 : f32
    %141 = vector.broadcast %cst_40 : f32 to vector<1x1xf32>
    %142 = arith.addf %138, %141 : vector<1x1xf32>
    %143 = math.rsqrt %142 : vector<1x1xf32>
    %144 = vector.broadcast %143 : vector<1x1xf32> to vector<1x64xf32>
    %145 = arith.mulf %140, %144 : vector<1x64xf32>
    %146 = arith.mulf %145, %126 : vector<1x64xf32>
    %147 = arith.addf %146, %127 : vector<1x64xf32>
    %148 = arith.negf %147 : vector<1x64xf32>
    %149 = math.exp %148 : vector<1x64xf32>
    %cst_41 = arith.constant 1.000000e+00 : f32
    %150 = vector.broadcast %cst_41 : f32 to vector<1x64xf32>
    %151 = arith.addf %150, %149 : vector<1x64xf32>
    %152 = arith.divf %150, %151 : vector<1x64xf32>
    %153 = vector.broadcast %152 : vector<1x64xf32> to vector<8x64xf32>
    %154 = arith.mulf %91, %153 : vector<8x64xf32>
    %155 = vector.extract_strided_slice %154 {offsets = [0, 0], sizes = [8, 16], strides = [1, 1]} : vector<8x64xf32> to vector<8x16xf32>
    %156 = vector.extract_strided_slice %154 {offsets = [0, 16], sizes = [8, 16], strides = [1, 1]} : vector<8x64xf32> to vector<8x16xf32>
    %157 = vector.extract_strided_slice %154 {offsets = [0, 32], sizes = [8, 16], strides = [1, 1]} : vector<8x64xf32> to vector<8x16xf32>
    %158 = vector.extract_strided_slice %154 {offsets = [0, 48], sizes = [8, 16], strides = [1, 1]} : vector<8x64xf32> to vector<8x16xf32>
    %159 = tpu.concatenate %155, %156, %157, %158 in 0 : vector<8x16xf32>, vector<8x16xf32>, vector<8x16xf32>, vector<8x16xf32> -> vector<32x16xf32>
    %c0_42 = arith.constant 0 : index
    %c0_43 = arith.constant 0 : index
    %160 = vector.load %arg12[%c0_42, %c0_43] : memref<16x4xf32, #tpu.memory_space<vmem>>, vector<16x4xf32>
    %cst_44 = arith.constant dense<0.000000e+00> : vector<32x4xf32>
    %161 = tpu.matmul %159, %160, %cst_44 {dimension_numbers = #tpu.dot_dimension_numbers<[1], [0], [0], [1], [0, 0, 1, 1], [], []>} : vector<32x16xf32>, vector<16x4xf32>, vector<32x4xf32> -> vector<32x4xf32>
    %c0_45 = arith.constant 0 : index
    %c0_46 = arith.constant 0 : index
    %162 = vector.load %arg13[%c0_45, %c0_46] : memref<1x4xf32, #tpu.memory_space<vmem>>, vector<1x4xf32>
    %163 = vector.broadcast %162 : vector<1x4xf32> to vector<32x4xf32>
    %164 = arith.addf %161, %163 : vector<32x4xf32>
    %c0_47 = arith.constant 0 : index
    %c0_48 = arith.constant 0 : index
    %165 = vector.load %arg14[%c0_47, %c0_48] : memref<1x4xf32, #tpu.memory_space<vmem>>, vector<1x4xf32>
    %c0_49 = arith.constant 0 : index
    %c0_50 = arith.constant 0 : index
    %166 = vector.load %arg15[%c0_49, %c0_50] : memref<1x4xf32, #tpu.memory_space<vmem>>, vector<1x4xf32>
    %cst_51 = arith.constant dense<0.000000e+00> : vector<32xf32>
    %167 = vector.multi_reduction <add>, %164, %cst_51 [1] : vector<32x4xf32> to vector<32xf32>
    %168 = vector.shape_cast %167 : vector<32xf32> to vector<32x1xf32>
    %cst_52 = arith.constant 4.000000e+00 : f32
    %169 = vector.broadcast %cst_52 : f32 to vector<32x1xf32>
    %170 = arith.divf %168, %169 : vector<32x1xf32>
    %171 = vector.broadcast %170 : vector<32x1xf32> to vector<32x4xf32>
    %172 = arith.subf %164, %171 : vector<32x4xf32>
    %173 = arith.mulf %172, %172 : vector<32x4xf32>
    %cst_53 = arith.constant dense<0.000000e+00> : vector<32xf32>
    %174 = vector.multi_reduction <add>, %173, %cst_53 [1] : vector<32x4xf32> to vector<32xf32>
    %175 = vector.shape_cast %174 : vector<32xf32> to vector<32x1xf32>
    %cst_54 = arith.constant 4.000000e+00 : f32
    %176 = vector.broadcast %cst_54 : f32 to vector<32x1xf32>
    %177 = arith.divf %175, %176 : vector<32x1xf32>
    %178 = vector.broadcast %170 : vector<32x1xf32> to vector<32x4xf32>
    %179 = arith.subf %164, %178 : vector<32x4xf32>
    %cst_55 = arith.constant 9.99999974E-6 : f32
    %180 = vector.broadcast %cst_55 : f32 to vector<32x1xf32>
    %181 = arith.addf %177, %180 : vector<32x1xf32>
    %182 = math.rsqrt %181 : vector<32x1xf32>
    %183 = vector.broadcast %182 : vector<32x1xf32> to vector<32x4xf32>
    %184 = arith.mulf %179, %183 : vector<32x4xf32>
    %185 = vector.broadcast %165 : vector<1x4xf32> to vector<32x4xf32>
    %186 = arith.mulf %184, %185 : vector<32x4xf32>
    %187 = vector.broadcast %166 : vector<1x4xf32> to vector<32x4xf32>
    %188 = arith.addf %186, %187 : vector<32x4xf32>
    %189 = vector.extract_strided_slice %188 {offsets = [0, 0], sizes = [8, 4], strides = [1, 1]} : vector<32x4xf32> to vector<8x4xf32>
    %190 = vector.extract_strided_slice %188 {offsets = [8, 0], sizes = [8, 4], strides = [1, 1]} : vector<32x4xf32> to vector<8x4xf32>
    %191 = vector.extract_strided_slice %188 {offsets = [16, 0], sizes = [8, 4], strides = [1, 1]} : vector<32x4xf32> to vector<8x4xf32>
    %192 = vector.extract_strided_slice %188 {offsets = [24, 0], sizes = [8, 4], strides = [1, 1]} : vector<32x4xf32> to vector<8x4xf32>
    %193 = tpu.concatenate %189, %190, %191, %192 in 1 : vector<8x4xf32>, vector<8x4xf32>, vector<8x4xf32>, vector<8x4xf32> -> vector<8x16xf32>
    %c0_56 = arith.constant 0 : index
    %c0_57 = arith.constant 0 : index
    %c0_58 = arith.constant 0 : index
    %194 = vector.load %arg16[%c0_56, %c0_57, %c0_58] : memref<1x8x16xf32, #tpu.memory_space<vmem>>, vector<1x8x16xf32>
    %195 = vector.shape_cast %194 : vector<1x8x16xf32> to vector<8x16xf32>
    %196 = vector.shape_cast %193 : vector<8x16xf32> to vector<1x8x16xf32>
    tpu.vector_store %arg16[%c0_56, %c0_57, %c0_58], %196 {strides = array<i32>} : memref<1x8x16xf32, #tpu.memory_space<vmem>>, vector<1x8x16xf32>,
    return
  }
  func.func @transform_0(%arg0: i32) -> (i32, i32, i32) {
    %c0_i32 = arith.constant 0 : i32
    %c0_i32_0 = arith.constant 0 : i32
    %c0_i32_1 = arith.constant 0 : i32
    return %arg0, %c0_i32, %c0_i32_0 : i32, i32, i32
  }
  func.func @transform_1(%arg0: i32) -> (i32, i32) {
    %c0_i32 = arith.constant 0 : i32
    %c0_i32_0 = arith.constant 0 : i32
    %c0_i32_1 = arith.constant 0 : i32
    return %c0_i32, %c0_i32_0 : i32, i32
  }
  func.func @transform_2(%arg0: i32) -> (i32, i32) {
    %c0_i32 = arith.constant 0 : i32
    %c0_i32_0 = arith.constant 0 : i32
    %c0_i32_1 = arith.constant 0 : i32
    return %c0_i32, %c0_i32_0 : i32, i32
  }
  func.func @transform_3(%arg0: i32) -> (i32, i32) {
    %c0_i32 = arith.constant 0 : i32
    %c0_i32_0 = arith.constant 0 : i32
    %c0_i32_1 = arith.constant 0 : i32
    return %c0_i32, %c0_i32_0 : i32, i32
  }
  func.func @transform_4(%arg0: i32) -> (i32, i32) {
    %c0_i32 = arith.constant 0 : i32
    %c0_i32_0 = arith.constant 0 : i32
    %c0_i32_1 = arith.constant 0 : i32
    return %c0_i32, %c0_i32_0 : i32, i32
  }
  func.func @transform_5(%arg0: i32) -> (i32, i32) {
    %c0_i32 = arith.constant 0 : i32
    %c0_i32_0 = arith.constant 0 : i32
    %c0_i32_1 = arith.constant 0 : i32
    return %c0_i32, %c0_i32_0 : i32, i32
  }
  func.func @transform_6(%arg0: i32) -> (i32, i32) {
    %c0_i32 = arith.constant 0 : i32
    %c0_i32_0 = arith.constant 0 : i32
    %c0_i32_1 = arith.constant 0 : i32
    return %c0_i32, %c0_i32_0 : i32, i32
  }
  func.func @transform_7(%arg0: i32) -> (i32, i32) {
    %c0_i32 = arith.constant 0 : i32
    %c0_i32_0 = arith.constant 0 : i32
    %c0_i32_1 = arith.constant 0 : i32
    return %c0_i32, %c0_i32_0 : i32, i32
  }
  func.func @transform_8(%arg0: i32) -> (i32, i32) {
    %c0_i32 = arith.constant 0 : i32
    %c0_i32_0 = arith.constant 0 : i32
    %c0_i32_1 = arith.constant 0 : i32
    return %c0_i32, %c0_i32_0 : i32, i32
  }
  func.func @transform_9(%arg0: i32) -> (i32, i32) {
    %c0_i32 = arith.constant 0 : i32
    %c0_i32_0 = arith.constant 0 : i32
    %c0_i32_1 = arith.constant 0 : i32
    return %c0_i32, %c0_i32_0 : i32, i32
  }
  func.func @transform_10(%arg0: i32) -> (i32, i32) {
    %c0_i32 = arith.constant 0 : i32
    %c0_i32_0 = arith.constant 0 : i32
    %c0_i32_1 = arith.constant 0 : i32
    return %c0_i32, %c0_i32_0 : i32, i32
  }
  func.func @transform_11(%arg0: i32) -> (i32, i32) {
    %c0_i32 = arith.constant 0 : i32
    %c0_i32_0 = arith.constant 0 : i32
    %c0_i32_1 = arith.constant 0 : i32
    return %c0_i32, %c0_i32_0 : i32, i32
  }
  func.func @transform_12(%arg0: i32) -> (i32, i32) {
    %c0_i32 = arith.constant 0 : i32
    %c0_i32_0 = arith.constant 0 : i32
    %c0_i32_1 = arith.constant 0 : i32
    return %c0_i32, %c0_i32_0 : i32, i32
  }
  func.func @transform_13(%arg0: i32) -> (i32, i32) {
    %c0_i32 = arith.constant 0 : i32
    %c0_i32_0 = arith.constant 0 : i32
    %c0_i32_1 = arith.constant 0 : i32
    return %c0_i32, %c0_i32_0 : i32, i32
  }
  func.func @transform_14(%arg0: i32) -> (i32, i32) {
    %c0_i32 = arith.constant 0 : i32
    %c0_i32_0 = arith.constant 0 : i32
    %c0_i32_1 = arith.constant 0 : i32
    return %c0_i32, %c0_i32_0 : i32, i32
  }
  func.func @transform_15(%arg0: i32) -> (i32, i32, i32) {
    %c0_i32 = arith.constant 0 : i32
    %c0_i32_0 = arith.constant 0 : i32
    %c0_i32_1 = arith.constant 0 : i32
    return %arg0, %c0_i32, %c0_i32_0 : i32, i32, i32
  }
}

</mosaic_0001>

<bundles_post_ra>
// kernel: tpu_custom_call.1
= control target key start
LH: loop header
LB: loop body
LE: loop exit
PB: predicated region body
PF: predicated region fallthrough
CT: control target
= control target key end

     0   :  { %s2130_s0 = inlined_call_operand.vmem [shape: f32[2,8,4], index: 0, kind: input, shape index: {}]   ;;  %s2131_s1 = inlined_call_operand.vmem [shape: f32[4,192], index: 1, kind: input, shape index: {}]   ;;  %s2132_s2 = inlined_call_operand.vmem [shape: f32[1,192], index: 2, kind: input, shape index: {}]   ;;  %s2133_s3 = inlined_call_operand.vmem [shape: f32[64,8], index: 3, kind: input, shape index: {}]   ;;  %s2134_s4 = inlined_call_operand.vmem [shape: f32[1,8], index: 4, kind: input, shape index: {}]   ;;  %s2135_s5 = inlined_call_operand.vmem [shape: f32[1,8], index: 5, kind: input, shape index: {}]   ;;  %s2136_s6 = inlined_call_operand.vmem [shape: f32[1,8], index: 6, kind: input, shape index: {}]   ;;  %s2137_s7 = inlined_call_operand.vmem [shape: f32[8,64], index: 7, kind: input, shape index: {}]   ;;  %s2138_s8 = inlined_call_operand.vmem [shape: f32[1,64], index: 8, kind: input, shape index: {}]   ;;  %s2139_s9 = inlined_call_operand.vmem [shape: f32[1,64], index: 9, kind: input, shape index: {}]   ;;  %s2140_s10 = inlined_call_operand.vmem [shape: f32[1,64], index: 10, kind: input, shape index: {}]   ;;  %s2141_s11 = inlined_call_operand.vmem [shape: f32[16,4], index: 11, kind: input, shape index: {}]   ;;  %s2142_s12 = inlined_call_operand.vmem [shape: f32[1,4], index: 12, kind: input, shape index: {}]   ;;  %s2143_s13 = inlined_call_operand.vmem [shape: f32[1,4], index: 13, kind: input, shape index: {}]   ;;  %s2144_s14 = inlined_call_operand.vmem [shape: f32[1,4], index: 14, kind: input, shape index: {}]   ;;  %s2145_s15 = inlined_call_operand.hbm [shape: f32[2,8,16], index: 15, kind: output, shape index: {}]  }
   0x1   :  { %2150 = sst [smem:[#allocation6_spill]] %s2130_s0 }
   0x2   :  { %2151 = sst [smem:[#allocation7_spill]] %s2131_s1 }
   0x3   :  { %2152 = sst [smem:[#allocation8_spill]] %s2132_s2 }
   0x4   :  { %2153 = sst [smem:[#allocation9_spill]] %s2133_s3 }
   0x5   :  { %20 = vsyncpa [#allocation3], 0 }
   0x6   :  { %22 = vsyncpa [#allocation3 + $0x1], 0  ;;  %s1853_s18 = smov 0   ;;  %s1855_s19 = smov 0  }
   0x7   :  { %s1857_s20 = smov 0   ;;  %s1859_s21 = smov 0  }
   0x8 LB: > { %s1874_s22 = sadd.s32 4294967295, %s1751_s21   ;;  %s1526_s23 = sadd.s32 4294967294, %s1751_s21   ;;  %s1751_s21 = sphi %s1859_s21, %s2169_s21   ;;  %s1747_s20 = sphi %s1857_s20, %s2168_s20   ;;  %s1743_s19 = sphi %s1855_s19, %s2167_s19   ;;  %s1739_s18 = sphi %s1853_s18, %s2166_s18  }
   0x9   : > { %s1878_s24 = sadd.s32 1, %s1751_s21   ;;  %s355_s25 = sadd.s32 1, %s1747_s20 }
   0xa   : > { %s352_s26 = ssub.s32 %s1751_s21, %s1878_s24  ;;  %p365_p0 = scmp.ne.s32.totalorder %s1747_s20, %s1743_s19 }
   0xb   : > { %p353_p1 = scmp.eq.s32.totalorder %s352_s26, 0  ;;  %p366_p2 = scmp.eq.s32.totalorder %s1874_s22, 1 }
   0xc   : > { %p371_p3 = scmp.ne.s32.totalorder %s1743_s19, %s1739_s18  ;;  %p372_p4 = scmp.eq.s32.totalorder %s1526_s23, 1 }
   0xd   : > { %s1889_s27 = scalar_select %p353_p1, %s1747_s20, %s355_s25  }
   0xe   : > { %p1891_p5 = por %p366_p2, %p365_p0  ;;  %p1895_p6 = por %p372_p4, %p371_p3 }
   0xf   : > { %2154 = sst [smem:[#allocation5_spill]] %s1889_s27  ;;  %p1529_p7 = scmp.ge.s32.totalorder %s1751_s21, 1 }
  0x10   : > { %p439_p8 = scmp.lt.s32.totalorder %s1751_s21, 3 }
  0x12   : > { %p440_p9 = pnand %p1529_p7, %p439_p8 }
  0x13   : > { %s2157_s1 = sld [smem:[#allocation7_spill]] (!%p440_p9)  ;;  %p486_p10 = scmp.lt.s32.totalorder (!%p440_p9), %s1874_s22, 1 }
  0x14   : > { %443 = sbr.rel (%p440_p9) target bundleno = 2607 (0xa2f), region = 80  ;;  %s2158_s0 = sld [smem:[#allocation6_spill]] (!%p440_p9) }
  0x15   : > { %s2159_s2 = sld [smem:[#allocation8_spill]] (!%p440_p9)  ;;  %s2148_s25 = smov (!%p440_p9), 80  }
  0x16   : > { %s2147_s26 = smov (!%p440_p9), 112   ;;  %s2146_s30 = smov (!%p440_p9), 96  }
  0x17   : > { %s1759_s16 = smov (!%p440_p9), 64   ;;  %s2160_s3 = sld [smem:[#allocation9_spill]] (!%p440_p9) }
  0x19   : > { %v491_v0 = vld [vmem:[%s2157_s1] sm:$0xff]  ;;  %s487_s17 = scalar_select %p486_p10, %s1874_s22, 1  ;;  %vm506_vm0 = vcmask 1043456   ;;  %vm502_vm1 = vcmask 31744   ;;  %vm590_vm2 = vcmask 64512   ;;  %vm1106_vm3 = vcmask 130048  }
  0x1a   : > { %499 = vst [vmem:[#allocation1] ss:$2 sm:$0xff] %v491_v0  ;;  %vm1108_vm4 = vcmask 195584   ;;  %vm1110_vm5 = vcmask 261120   ;;  %vm1112_vm6 = vcmask 326656   ;;  %vm1114_vm7 = vcmask 392192  }
  0x1b   : > { %s1531_s23 = sshll.u32 %s487_s17, 3  ;;  %v1914_v3 = vld [vmem:[%s2159_s2] sm:$0x3]  ;;  %s1753_s17 = smov 104   ;;  %vm1116_vm8 = vcmask 457728   ;;  %vm1118_vm9 = vcmask 523264  }
  0x1c   : > { %s489_s27 = scalar_lea.vmem %s2158_s0, %s1531_s23  ;;  %v494_v4 = vperm.slane %v1914_v3, 0  ;;  %s1754_s23 = smov 88   ;;  %v495_v26 = vperm.slane %v1914_v3, 1  ;;  %vm1168_vm11 = vcmask 57344   ;;  %vm1220_vm15 = vcmask 516096  }
  0x1d   : > { %v490_v1 = vld [vmem:[%s489_s27] sm:$0xff]  ;;  %s1755_s27 = smov 120   ;;  %s1760_s0 = smov 72  }
  0x1e   : > { %s2163_s2 = smov 96   ;;  %s1771_s1 = smov 4  }
  0x21   : > { %v500_v2 = vld.sshfl [vmem:[#allocation1] sm:$0xff pattern:$0x75316420]  ;;  %v501_v16 = vld.sshfl [vmem:[#allocation1 + $0x8] sm:$0xff pattern:$0x75316420] }
  0x22   : > { %1532 = vmatpush.msk.msra.mxu3 %vm506_vm0, %v500_v2  ;;  %1534 = vmatpush.msk.msra.mxu1 %vm506_vm0, %v501_v16 }
  0x23   : > { %1533 = vmatmul.msk.f32.vlgmr.msra.gmra.mxu3 %vm502_vm1, %v490_v1  ;;  %1535 = vmatmul.msk.f32.vlgmr.msra.gmra.mxu1 %vm502_vm1, %v490_v1 }
  0xa0   : > { %v548_v27 = vpop.f32.mrf.mxu1 }
  0xa1   : > { %v1944_v28 = vadd.f32 %v548_v27, %v495_v26 }
  0xa6   : > { %v528_v5 = vpop.f32.mrf.mxu3 }
  0xa7   : > { %v529_v6 = vadd.f32 %v528_v5, %v494_v4 }
  0xa9   : > { %556 = vrot.lane.b32.xlu2 %v529_v6, %s1753_s17  ;;  %560 = vrot.lane.b32.xlu1 %v529_v6, %s1754_s23 }
  0xaa   : > { %552 = vrot.lane.b32.xlu0 %v529_v6, %s1755_s27 }
  0xb1   : > { %562 = vrot.lane.b32.xlu2 %v529_v6, %s2148_s25  ;;  %554 = vrot.lane.b32.xlu1 %v529_v6, %s2147_s26 }
  0xb2   : > { %558 = vrot.lane.b32.xlu0 %v529_v6, %s2146_s30 }
  0xb9   : > { %588 = vrot.lane.b32.xlu1 %v529_v6, %s1759_s16 }
  0xba   : > { %564 = vrot.lane.b32.xlu0 %v529_v6, %s1760_s0 }
 0x103   : > { %v557_v7 = vpop.permute.xlu2 %556 }
 0x10b   : > { %v563_v10 = vpop.permute.xlu2 %562 }
 0x11b   : > { %v561_v8 = vpop.permute.xlu1 %560 }
 0x11c   : > { %v553_v9 = vpop.permute.xlu0 %552  ;;  %719 = vrot.lane.b32.xlu1 %v561_v8, %s1759_s16 }
 0x11d   : > { %615 = vrot.lane.b32.xlu2 %v553_v9, %s1759_s16 }
 0x123   : > { %v555_v11 = vpop.permute.xlu1 %554 }
 0x124   : > { %v559_v12 = vpop.permute.xlu0 %558  ;;  %745 = vrot.lane.b32.xlu1 %v563_v10, %s1759_s16 }
 0x125   : > { %641 = vrot.lane.b32.xlu2 %v555_v11, %s1759_s16  ;;  %693 = vrot.lane.b32.xlu0 %v559_v12, %s1759_s16 }
 0x12b   : > { %v589_v13 = vpop.permute.xlu1 %588 }
 0x12c   : > { %v565_v14 = vpop.permute.xlu0 %564  ;;  %1536 = vmatpush.xpose.msk.msra.mxu2 %vm590_vm2, %v589_v13 }
 0x12d   : > { %667 = vrot.lane.b32.xlu0 %v557_v7, %s1759_s16  ;;  %771 = vrot.lane.b32.xlu2 %v565_v14, %s1759_s16  ;;  %s1765_s16 = smov 40  }
 0x12f   : > { %1537 = vmatmul.msk.f32.vlgmr.msra.gmra.mxu2 %vm590_vm2, %v529_v6 }
 0x177   : > { %v616_v15 = vpop.permute.xlu2 %615 }
 0x178   : > { %1538 = vmatpush.xpose.msk.msrb.mxu3 %vm590_vm2, %v616_v15 }
 0x17b   : > { %1539 = vmatmul.msk.f32.vlgmr.msrb.gmra.mxu3 %vm590_vm2, %v553_v9 }
 0x17f   : > { %v642_v17 = vpop.permute.xlu2 %641 }
 0x180   : > { %1540 = vmatpush.xpose.msk.msra.mxu0 %vm590_vm2, %v642_v17 }
 0x183   : > { %1541 = vmatmul.msk.f32.vlgmr.msra.gmra.mxu0 %vm590_vm2, %v555_v11 }
 0x187   : > { %v772_v22 = vpop.permute.xlu2 %771 }
 0x18e   : > { %v720_v18 = vpop.permute.xlu1 %719 }
 0x18f   : > { %1546 = vmatpush.xpose.msk.msra.mxu3 %vm590_vm2, %v720_v18 }
 0x192   : > { %1547 = vmatmul.msk.f32.vlgmr.msra.gmra.mxu3 %vm590_vm2, %v561_v8 }
 0x196   : > { %v746_v19 = vpop.permute.xlu1 %745 }
 0x197   : > { %v694_v20 = vpop.permute.xlu0 %693  ;;  %1548 = vmatpush.xpose.msk.msrb.mxu0 %vm590_vm2, %v746_v19 }
 0x198   : > { %1544 = vmatpush.xpose.msk.msrb.mxu2 %vm590_vm2, %v694_v20 }
 0x19a   : > { %1549 = vmatmul.msk.f32.vlgmr.msrb.gmra.mxu0 %vm590_vm2, %v563_v10 }
 0x19b   : > { %1545 = vmatmul.msk.f32.vlgmr.msrb.gmra.mxu2 %vm590_vm2, %v559_v12 }
 0x19c   : > { %911 = vmatpush.msra.mxu2 %v1944_v28 }
 0x19f   : > { %v668_v21 = vpop.permute.xlu0 %667 }
 0x1a0   : > { %1542 = vmatpush.xpose.msk.msrb.mxu1 %vm590_vm2, %v668_v21 }
 0x1a3   : > { %1543 = vmatmul.msk.f32.vlgmr.msrb.gmra.mxu1 %vm590_vm2, %v557_v7 }
 0x1a4   : > { %1550 = vmatpush.xpose.msk.msra.mxu1 %vm590_vm2, %v772_v22 }
 0x1ab   : > { %1551 = vmatmul.msk.f32.vlgmr.msra.gmra.mxu1 %vm590_vm2, %v565_v14 }
 0x1b2   : > { %v612_v23 = vpop.f32.mrf.mxu2 }
 0x1b3   : > { %v797_v24 = vmul.f32 0.35355338, %v612_v23 }
 0x1b5   : > { %v805_v25 = vsel %vm590_vm2, %v797_v24, -inf }
 0x1b6   : > { %806 = vmax.xlane.f32.xlu0 %v805_v25 }
 0x1fe   : > { %v638_v29 = vpop.f32.mrf.mxu3 }
 0x1ff   : > { %v798_v30 = vmul.f32 0.35355338, %v638_v29 }
 0x200   : > { %v664_v31 = vpop.f32.mrf.mxu0 }
 0x201   : > { %v799_v32 = vmul.f32 0.35355338, %v664_v31  ;;  %v808_v33 = vsel %vm590_vm2, %v798_v30, -inf }
 0x202   : > { %809 = vmax.xlane.f32.xlu1 %v808_v33 }
 0x203   : > { %v811_v34 = vsel %vm590_vm2, %v799_v32, -inf }
 0x204   : > { %812 = vmax.xlane.f32.xlu2 %v811_v34 }
 0x215   : > { %v742_v35 = vpop.f32.mrf.mxu3 }
 0x216   : > { %v1949_v36 = vmul.f32 0.35355338, %v742_v35 }
 0x217   : > { %v768_v43 = vpop.f32.mrf.mxu0 }
 0x218   : > { %v820_v37 = vsel %vm590_vm2, %v1949_v36, -inf  ;;  %v1955_v45 = vmul.f32 0.35355338, %v768_v43 }
 0x219   : > { %821 = vmax.xlane.f32.xlu1 %v820_v37 }
 0x21a   : > { %v823_v48 = vsel %vm590_vm2, %v1955_v45, -inf }
 0x21e   : > { %v716_v38 = vpop.f32.mrf.mxu2 }
 0x21f   : > { %v801_v39 = vmul.f32 0.35355338, %v716_v38 }
 0x220   : > { %v690_v40 = vpop.f32.mrf.mxu1 }
 0x221   : > { %v800_v41 = vmul.f32 0.35355338, %v690_v40  ;;  %v817_v42 = vsel %vm590_vm2, %v801_v39, -inf }
 0x222   : > { %818 = vmax.xlane.f32.xlu2 %v817_v42 }
 0x223   : > { %v814_v44 = vsel %vm590_vm2, %v800_v41, -inf }
 0x224   : > { %815 = vmax.xlane.f32.xlu0 %v814_v44 }
 0x228   : > { %v794_v46 = vpop.f32.mrf.mxu1 }
 0x229   : > { %v804_v47 = vmul.f32 0.35355338, %v794_v46  ;;  %v807_v49 = vpop.xlane.xlu0 %806 }
 0x22a   : > { %824 = vmax.xlane.f32.xlu2 %v823_v48  ;;  %v829_v50 = vsub.f32 %v797_v24, %v807_v49 }
 0x22b   : > { %v826_v51 = vsel %vm590_vm2, %v804_v47, -inf }
 0x22c   : > { %v837_v52 = vmul.f32 1.442695, %v829_v50  ;;  %827 = vmax.xlane.f32.xlu0 %v826_v51 }
 0x22e   : > { %1635 = vpow2.f32 %v837_v52 }
 0x234   : > { %v1636_v53 = vpop.eup %1635 }
 0x235   : > { %v853_v54 = vsel %vm590_vm2, %v1636_v53, 0.0 }
 0x236   : > { %854 = vadd.xlane.f32.xlu1 %v853_v54 }
 0x275   : > { %v810_v62 = vpop.xlane.xlu1 %809 }
 0x276   : > { %v830_v2 = vsub.f32 %v798_v30, %v810_v62 }
 0x277   : > { %v813_v55 = vpop.xlane.xlu2 %812 }
 0x278   : > { %v831_v56 = vsub.f32 %v799_v32, %v813_v55  ;;  %v839_v4 = vmul.f32 1.442695, %v830_v2  ;;  %v1140_v2 = vld [vmem:[%s2160_s3 + $0x30] sm:$0xff] }
 0x27a   : > { %v841_v57 = vmul.f32 1.442695, %v831_v56 }
 0x27c   : > { %1637 = vpow2.f32 %v841_v57 }
 0x282   : > { %v1638_v58 = vpop.eup %1637 }
 0x283   : > { %v859_v59 = vsel %vm590_vm2, %v1638_v58, 0.0 }
 0x284   : > { %860 = vadd.xlane.f32.xlu0 %v859_v59 }
 0x28c   : > { %v822_v6 = vpop.xlane.xlu1 %821 }
 0x28d   : > { %v834_v15 = vsub.f32 %v1949_v36, %v822_v6 }
 0x28f   : > { %v847_v16 = vmul.f32 1.442695, %v834_v15 }
 0x295   : > { %v819_v60 = vpop.xlane.xlu2 %818 }
 0x296   : > { %v833_v61 = vsub.f32 %v801_v39, %v819_v60 }
 0x297   : > { %v816_v63 = vpop.xlane.xlu0 %815 }
 0x298   : > { %v845_v0 = vmul.f32 1.442695, %v833_v61  ;;  %v832_v1 = vsub.f32 %v800_v41, %v816_v63  ;;  %570 = vrot.lane.b32.xlu0 %v1944_v28, %s2147_s26  ;;  %s1767_s26 = smov 48  }
 0x29a   : > { %1639 = vpow2.f32 %v845_v0  ;;  %v843_v3 = vmul.f32 1.442695, %v832_v1  ;;  %v1141_v1 = vld [vmem:[%s2160_s3 + $0x38] sm:$0xff] }
 0x29c   : > { %1641 = vpow2.f32 %v843_v3  ;;  %v1139_v3 = vld [vmem:[%s2160_s3 + $0x28] sm:$0xff] }
 0x29d   : > { %1643 = vpow2.f32 %v839_v4  ;;  %v825_v22 = vpop.xlane.xlu2 %824  ;;  %v1138_v4 = vld [vmem:[%s2160_s3 + $0x20] sm:$0xff] }
 0x29e   : > { %v835_v23 = vsub.f32 %v1955_v45, %v825_v22 }
 0x29f   : > { %v828_v18 = vpop.xlane.xlu0 %827 }
 0x2a0   : > { %v1640_v5 = vpop.eup %1639  ;;  %573 = vrot.lane.b32.xlu0 %v1944_v28, %s1753_s17  ;;  %v836_v20 = vsub.f32 %v804_v47, %v828_v18  ;;  %v849_v24 = vmul.f32 1.442695, %v835_v23  ;;  %s1762_s17 = smov 24  }
 0x2a1   : > { %v865_v7 = vsel %vm590_vm2, %v1640_v5, 0.0 }
 0x2a2   : > { %v1642_v8 = vpop.eup %1641  ;;  %866 = vadd.xlane.f32.xlu1 %v865_v7  ;;  %v851_v21 = vmul.f32 1.442695, %v836_v20  ;;  %v1136_v7 = vld [vmem:[%s2160_s3 + $0x10] sm:$0xff] }
 0x2a3   : > { %v862_v9 = vsel %vm590_vm2, %v1642_v8, 0.0  ;;  %v1644_v10 = vpop.eup %1643 }
 0x2a4   : > { %863 = vadd.xlane.f32.xlu2 %v862_v9  ;;  %v856_v12 = vsel %vm590_vm2, %v1644_v10, 0.0  ;;  %v1134_v9 = vld [vmem:[%s2160_s3] sm:$0xff] }
 0x2a8   : > { %579 = vrot.lane.b32.xlu0 %v1944_v28, %s1754_s23  ;;  %s1763_s23 = smov 32  }
 0x2a9   : > { %v855_v11 = vpop.xlane.xlu1 %854 }
 0x2aa   : > { %1645 = vrcp.f32 %v855_v11  ;;  %v1768_v11 = vmov 8.0  }
 0x2ab   : > { %1647 = vpow2.f32 %v847_v16 }
 0x2ac   : > { %857 = vadd.xlane.f32.xlu2 %v856_v12  ;;  %1649 = vpow2.f32 %v851_v21 }
 0x2ad   : > { %1651 = vpow2.f32 %v849_v24 }
 0x2b0   : > { %v1646_v13 = vpop.eup %1645 }
 0x2b1   : > { %v885_v14 = vmul.f32 %v1646_v13, %v1636_v53  ;;  %v1648_v17 = vpop.eup %1647 }
 0x2b2   : > { %v868_v19 = vsel %vm590_vm2, %v1648_v17, 0.0  ;;  %v1650_v25 = vpop.eup %1649 }
 0x2b3   : > { %1552 = vmatmul.msk.f32.vlgmr.msra.gmra.mxu2 %vm590_vm2, %v885_v14  ;;  %v874_v26 = vsel %vm590_vm2, %v1650_v25, 0.0  ;;  %v1652_v27 = vpop.eup %1651 }
 0x2b4   : > { %v871_v29 = vsel %vm590_vm2, %v1652_v27, 0.0 }
 0x2bb   : > { %567 = vrot.lane.b32.xlu1 %v1944_v28, %s1755_s27  ;;  %s2149_s27 = smov 8  }
 0x2c4   : > { %576 = vrot.lane.b32.xlu2 %v1944_v28, %s2146_s30  ;;  %s1766_s30 = smov 56  }
 0x2d2   : > { %869 = vadd.xlane.f32.xlu0 %v868_v19 }
 0x2e5   : > { %875 = vadd.xlane.f32.xlu1 %v874_v26 }
 0x2e6   : > { %585 = vrot.lane.b32.xlu0 %v1944_v28, %s1760_s0  ;;  %s1761_s0 = smov 16  }
 0x2ed   : > { %872 = vadd.xlane.f32.xlu2 %v871_v29 }
 0x2f7   : > { %v861_v30 = vpop.xlane.xlu0 %860 }
 0x2f8   : > { %1653 = vrcp.f32 %v861_v30 }
 0x2fe   : > { %v1654_v31 = vpop.eup %1653 }
 0x2ff   : > { %v887_v32 = vmul.f32 %v1654_v31, %v1638_v58 }
 0x305   : > { %582 = vrot.lane.b32.xlu2 %v1944_v28, %s2148_s25  ;;  %s1709_s25 = scalar_lea.hbm %s2145_s15, 16 }
 0x30a   : > { %v571_v33 = vpop.permute.xlu0 %570 }
 0x30b   : > { %957 = vmatpush.msra.mxu0 %v571_v33 }
 0x30c   : > { %1554 = vmatmul.msk.f32.vlgmr.msra.gmra.mxu0 %vm590_vm2, %v887_v32 }
 0x312   : > { %v574_v34 = vpop.permute.xlu0 %573 }
 0x313   : > { %980 = vmatpush.msrb.mxu1 %v574_v34 }
 0x315   : > { %v867_v36 = vpop.xlane.xlu1 %866 }
 0x317   : > { %v864_v35 = vpop.xlane.xlu2 %863 }
 0x318   : > { %1655 = vrcp.f32 %v864_v35 }
 0x319   : > { %1657 = vrcp.f32 %v867_v36 }
 0x31a   : > { %v580_v45 = vpop.permute.xlu0 %579 }
 0x31e   : > { %v1656_v37 = vpop.eup %1655 }
 0x31f   : > { %v888_v38 = vmul.f32 %v1656_v37, %v1642_v8  ;;  %v858_v39 = vpop.xlane.xlu2 %857  ;;  %v1658_v40 = vpop.eup %1657  ;;  %v1135_v8 = vld [vmem:[%s2160_s3 + $0x8] sm:$0xff] }
 0x320   : > { %1659 = vrcp.f32 %v858_v39  ;;  %v889_v28 = vmul.f32 %v1658_v40, %v1640_v5  ;;  %v1137_v5 = vld [vmem:[%s2160_s3 + $0x18] sm:$0xff]  ;;  %v1142_v39 = vld [vmem:[%s2134_s4] sm:$0x1] }
 0x321   : > { %1555 = vmatmul.msk.f32.vlgmr.msrb.gmra.mxu1 %vm590_vm2, %v888_v38 }
 0x326   : > { %v1660_v42 = vpop.eup %1659 }
 0x327   : > { %v577_v41 = vpop.permute.xlu2 %576  ;;  %v886_v43 = vmul.f32 %v1660_v42, %v1644_v10 }
 0x328   : > { %1003 = vmatpush.msrb.mxu2 %v577_v41 }
 0x329   : > { %1556 = vmatmul.msk.f32.vlgmr.msrb.gmra.mxu2 %vm590_vm2, %v889_v28 }
 0x32a   : > { %1154 = vmatpush.msra.mxu2 %v1141_v1 }
 0x32c   : > { %1155 = vmatpush.msra.mxu2 %v1140_v2 }
 0x32d   : > { %v568_v44 = vpop.permute.xlu1 %567 }
 0x32e   : > { %934 = vmatpush.msrb.mxu3 %v568_v44  ;;  %1156 = vmatpush.msra.mxu2 %v1139_v3  ;;  %v1769_v3 = vmov 64.0  }
 0x32f   : > { %1553 = vmatmul.msk.f32.vlgmr.msrb.gmra.mxu3 %vm590_vm2, %v886_v43 }
 0x330   : > { %1026 = vmatpush.msra.mxu3 %v580_v45  ;;  %1157 = vmatpush.msra.mxu2 %v1138_v4 }
 0x332   : > { %1158 = vmatpush.msra.mxu2 %v1137_v5 }
 0x334   : > { %1159 = vmatpush.msra.mxu2 %v1136_v7 }
 0x336   : > { %v913_v59 = vpop.f32.mrf.mxu2  ;;  %1160 = vmatpush.msra.mxu2 %v1135_v8 }
 0x338   : > { %1161 = vmatpush.msra.mxu2 %v1134_v9 }
 0x345   : > { %v870_v46 = vpop.xlane.xlu0 %869 }
 0x346   : > { %1661 = vrcp.f32 %v870_v46 }
 0x34c   : > { %v1662_v47 = vpop.eup %1661 }
 0x34d   : > { %v890_v48 = vmul.f32 %v1662_v47, %v1648_v17  ;;  %v1193_v47 = vld [vmem:[%s2137_s7] sm:$0xff] }
 0x34e   : > { %1213 = vmatpush.msrb.mxu3 %v1193_v47 }
 0x34f   : > { %1557 = vmatmul.msk.f32.vlgmr.msra.gmra.mxu3 %vm590_vm2, %v890_v48 }
 0x358   : > { %v876_v49 = vpop.xlane.xlu1 %875  ;;  %v586_v50 = vpop.permute.xlu0 %585 }
 0x359   : > { %1663 = vrcp.f32 %v876_v49  ;;  %1072 = vmatpush.msra.mxu1 %v586_v50 }
 0x35f   : > { %v1664_v51 = vpop.eup %1663 }
 0x360   : > { %v892_v52 = vmul.f32 %v1664_v51, %v1650_v25  ;;  %v873_v53 = vpop.xlane.xlu2 %872 }
 0x361   : > { %1665 = vrcp.f32 %v873_v53 }
 0x362   : > { %1559 = vmatmul.msk.f32.vlgmr.msra.gmra.mxu1 %vm590_vm2, %v892_v52  ;;  %1667 = vrcp.f32 %v1768_v11 }
 0x367   : > { %v1666_v54 = vpop.eup %1665 }
 0x368   : > { %v891_v55 = vmul.f32 %v1666_v54, %v1652_v27  ;;  %v583_v56 = vpop.permute.xlu2 %582  ;;  %v1668_v15 = vpop.eup %1667 }
 0x369   : > { %1049 = vmatpush.msrb.mxu0 %v583_v56  ;;  %v1127_v18 = vmul.f32 8.0, %v1668_v15  ;;  %vm1131_vm10 = vweird.f32 %v1668_v15 }
 0x36a   : > { %1558 = vmatmul.msk.f32.vlgmr.msrb.gmra.mxu0 %vm590_vm2, %v891_v55 }
 0x36b   : > { %v1128_v25 = vsub.f32 1.0, %v1127_v18  ;;  %v1281_v18 = vld [vmem:[%s2141_s11 + $0x8] sm:$0xff] }
 0x36c   : > { %1308 = vmatpush.msra.mxu0 %v1281_v18  ;;  %1571 = vmatpush.msrb.mxu1 %v1281_v18 }
 0x36d   : > { %v1129_v30 = vmul.f32 %v1668_v15, %v1128_v25 }
 0x36f   : > { %v1130_v33 = vadd.f32 %v1668_v15, %v1129_v30 }
 0x371   : > { %v1132_v36 = vsel %vm1131_vm10, %v1668_v15, %v1130_v33 }
 0x389   : > { %v959_v57 = vpop.f32.mrf.mxu0 }
 0x38a   : > { %1082 = vrot.lane.b32.xlu0 %v959_v57, %s1761_s0  ;;  %v1166_v57 = vld [vmem:[%s2135_s5] sm:$0x1] }
 0x39e   : > { %v982_v58 = vpop.f32.mrf.mxu1 }
 0x39f   : > { %1086 = vrot.lane.b32.xlu2 %v982_v58, %s1762_s17 }
 0x3ac   : > { %v1005_v60 = vpop.f32.mrf.mxu2 }
 0x3ad   : > { %1090 = vrot.lane.b32.xlu0 %v1005_v60, %s1763_s23  ;;  %v1167_v60 = vld [vmem:[%s2136_s6] sm:$0x1]  ;;  %s2162_s23 = smov 112  }
 0x3b2   : > { %v936_v61 = vpop.f32.mrf.mxu3 }
 0x3b3   : > { %1078 = vrot.lane.b32.xlu2 %v936_v61, %s2149_s27  ;;  %s2161_s27 = smov 80  }
 0x3d2   : > { %v1028_v62 = vpop.f32.mrf.mxu3 }
 0x3d3   : > { %1094 = vrot.lane.b32.xlu2 %v1028_v62, %s1765_s16 }
 0x3df   : > { %v1074_v63 = vpop.f32.mrf.mxu1 }
 0x3e0   : > { %1102 = vrot.lane.b32.xlu0 %v1074_v63, %s1766_s30  ;;  %v1194_v63 = vld [vmem:[%s2138_s8] sm:$0x1]  ;;  %s1568_s30 = sshll.u32 %s1874_s22, 3 }
 0x3e1   : > { %s1462_s0 = scalar_lea.hbm %s2145_s15, %s1568_s30 }
 0x3e7   : > { %v1051_v0 = vpop.f32.mrf.mxu0 }
 0x3e8   : > { %1098 = vrot.lane.b32.xlu1 %v1051_v0, %s1767_s26 }
 0x3f9   : > { %v1087_v6 = vpop.permute.xlu2 %1086 }
 0x3fc   : > { %v1083_v10 = vpop.permute.xlu0 %1082 }
 0x40d   : > { %v1079_v12 = vpop.permute.xlu2 %1078 }
 0x40e   : > { %v1105_v13 = vsel %vm590_vm2, %v913_v59, %v1079_v12 }
 0x40f   : > { %v1107_v16 = vsel %vm1106_vm3, %v1105_v13, %v1083_v10 }
 0x410   : > { %v1109_v19 = vsel %vm1108_vm4, %v1107_v16, %v1087_v6 }
 0x41f   : > { %v1091_v14 = vpop.permute.xlu0 %1090 }
 0x420   : > { %v1111_v20 = vsel %vm1110_vm5, %v1109_v19, %v1091_v14  ;;  %v1280_v19 = vld [vmem:[%s2141_s11] sm:$0xff] }
 0x421   : > { %1309 = vmatpush.msra.mxu0 %v1280_v19  ;;  %1572 = vmatpush.msrb.mxu1 %v1280_v19 }
 0x42d   : > { %v1095_v17 = vpop.permute.xlu2 %1094 }
 0x42e   : > { %v1113_v21 = vsel %vm1112_vm6, %v1111_v20, %v1095_v17 }
 0x452   : > { %v1103_v23 = vpop.permute.xlu0 %1102 }
 0x45a   : > { %v1099_v22 = vpop.permute.xlu1 %1098 }
 0x45b   : > { %v1115_v24 = vsel %vm1114_vm7, %v1113_v21, %v1099_v22 }
 0x45c   : > { %v2019_v26 = vsel %vm1116_vm8, %v1115_v24, %v1103_v23 }
 0x45d   : > { %v1119_v27 = vsel %vm1118_vm9, %v2019_v26, 0.0 }
 0x45e   : > { %v1120_v29 = vrot.slane %v1119_v27, 4 }
 0x460   : > { %v1121_v31 = vadd.f32 %v1120_v29, %v1119_v27  ;;  %v1218_v27 = vld [vmem:[%s2139_s9] sm:$0x1] }
 0x462   : > { %v1122_v32 = vrot.slane %v1121_v31, 2 }
 0x464   : > { %v1123_v34 = vadd.f32 %v1122_v32, %v1121_v31  ;;  %v1219_v31 = vld [vmem:[%s2140_s10] sm:$0x1] }
 0x466   : > { %v1124_v35 = vrot.slane %v1123_v34, 1 }
 0x468   : > { %v1125_v37 = vadd.f32 %v1124_v35, %v1123_v34 }
 0x46a   : > { %v1133_v38 = vmul.f32 %v1132_v36, %v1125_v37 }
 0x46c   : > { %1560 = vmatmul.msk.f32.vlgmr.msra.gmra.mxu2 %vm1118_vm9, %v1133_v38 }
 0x4ef   : > { %v1163_v40 = vpop.f32.mrf.mxu2 }
 0x4f0   : > { %v1164_v28 = vadd.f32 %v1163_v40, %v1142_v39 }
 0x4f2   : > { %v1169_v41 = vsel %vm1168_vm11, %v1164_v28, 0.0 }
 0x4f3   : > { %1170 = vadd.xlane.f32.xlu2 %v1169_v41 }
 0x566   : > { %v1171_v42 = vpop.xlane.xlu2 %1170 }
 0x567   : > { %v1172_v43 = vmul.f32 %v1171_v42, %v1132_v36 }
 0x569   : > { %v1173_v44 = vsub.f32 %v1164_v28, %v1172_v43 }
 0x56b   : > { %v1174_v45 = vmul.f32 %v1173_v44, %v1173_v44 }
 0x56d   : > { %v1175_v46 = vsel %vm1168_vm11, %v1174_v45, 0.0 }
 0x56e   : > { %1176 = vadd.xlane.f32.xlu0 %v1175_v46 }
 0x5e1   : > { %v1177_v48 = vpop.xlane.xlu0 %1176 }
 0x5e2   : > { %v1178_v49 = vmul.f32 %v1177_v48, %v1132_v36 }
 0x5e4   : > { %v1179_v50 = vadd.f32 1e-05, %v1178_v49 }
 0x5e6   : > { %1669 = vrsqrt.f32 %v1179_v50  ;;  %vm1186_vm13 = vweird.f32 %v1179_v50 }
 0x5e7   : > { %1671 = vrcp.f32 %v1769_v3 }
 0x5ec   : > { %v1670_v51 = vpop.eup %1669 }
 0x5ed   : > { %v1181_v52 = vmul.f32 %v1670_v51, %v1179_v50  ;;  %vm1187_vm12 = vweird.f32 %v1670_v51  ;;  %v1672_v4 = vpop.eup %1671 }
 0x5ee   : > { %vm1188_vm14 = vmor %vm1186_vm13, %vm1187_vm12  ;;  %v1225_v5 = vmul.f32 64.0, %v1672_v4  ;;  %vm1229_vm0 = vweird.f32 %v1672_v4 }
 0x5ef   : > { %v1182_v53 = vmul.f32 %v1670_v51, %v1181_v52 }
 0x5f0   : > { %v1226_v6 = vsub.f32 1.0, %v1225_v5 }
 0x5f1   : > { %v1183_v54 = vmul.f32 0.5, %v1182_v53 }
 0x5f2   : > { %v1227_v7 = vmul.f32 %v1672_v4, %v1226_v6 }
 0x5f3   : > { %v1184_v55 = vsub.f32 1.5, %v1183_v54 }
 0x5f4   : > { %v1228_v8 = vadd.f32 %v1672_v4, %v1227_v7 }
 0x5f5   : > { %v1185_v56 = vmul.f32 %v1670_v51, %v1184_v55 }
 0x5f6   : > { %v1230_v9 = vsel %vm1229_vm0, %v1672_v4, %v1228_v8 }
 0x5f7   : > { %v1189_v58 = vsel %vm1188_vm14, %v1670_v51, %v1185_v56 }
 0x5f8   : > { %v1190_v59 = vmul.f32 %v1189_v58, %v1173_v44 }
 0x5fa   : > { %v1191_v61 = vmul.f32 %v1190_v59, %v1166_v57 }
 0x5fc   : > { %v1192_v62 = vadd.f32 %v1191_v61, %v1167_v60 }
 0x5fe   : > { %1561 = vmatmul.msk.f32.vlgmr.msrb.gmra.mxu3 %vm590_vm2, %v1192_v62 }
 0x681   : > { %v1215_v0 = vpop.f32.mrf.mxu3 }
 0x682   : > { %v1216_v1 = vadd.f32 %v1215_v0, %v1194_v63  ;;  %v1770_v63 = vmov 4.0  }
 0x684   : > { %v1221_v2 = vsel %vm1220_vm15, %v1216_v1, 0.0 }
 0x685   : > { %1222 = vadd.xlane.f32.xlu1 %v1221_v2 }
 0x6f8   : > { %v1223_v10 = vpop.xlane.xlu1 %1222 }
 0x6f9   : > { %v1231_v11 = vmul.f32 %v1230_v9, %v1223_v10 }
 0x6fb   : > { %v1232_v12 = vsub.f32 %v1216_v1, %v1231_v11 }
 0x6fd   : > { %v1233_v13 = vmul.f32 %v1232_v12, %v1232_v12 }
 0x6ff   : > { %v1234_v14 = vsel %vm1220_vm15, %v1233_v13, 0.0 }
 0x700   : > { %1235 = vadd.xlane.f32.xlu2 %v1234_v14 }
 0x773   : > { %v1236_v15 = vpop.xlane.xlu2 %1235 }
 0x774   : > { %v1237_v16 = vmul.f32 %v1236_v15, %v1230_v9 }
 0x776   : > { %v1238_v17 = vadd.f32 1e-05, %v1237_v16 }
 0x778   : > { %1673 = vrsqrt.f32 %v1238_v17  ;;  %vm1245_vm5 = vweird.f32 %v1238_v17 }
 0x77e   : > { %v1674_v20 = vpop.eup %1673 }
 0x77f   : > { %v1240_v21 = vmul.f32 %v1674_v20, %v1238_v17  ;;  %vm1246_vm4 = vweird.f32 %v1674_v20 }
 0x780   : > { %vm1247_vm6 = vmor %vm1245_vm5, %vm1246_vm4 }
 0x781   : > { %v1241_v22 = vmul.f32 %v1674_v20, %v1240_v21 }
 0x783   : > { %v1242_v23 = vmul.f32 0.5, %v1241_v22 }
 0x785   : > { %v1243_v24 = vsub.f32 1.5, %v1242_v23 }
 0x787   : > { %v1244_v25 = vmul.f32 %v1674_v20, %v1243_v24 }
 0x789   : > { %v1248_v29 = vsel %vm1247_vm6, %v1674_v20, %v1244_v25 }
 0x78a   : > { %v1249_v30 = vmul.f32 %v1248_v29, %v1232_v12 }
 0x78c   : > { %v1250_v32 = vmul.f32 %v1249_v30, %v1218_v27 }
 0x78e   : > { %v1251_v33 = vadd.f32 %v1250_v32, %v1219_v31 }
 0x790   : > { %v1562_v34 = vmul.f32 -1.442695, %v1251_v33 }
 0x792   : > { %1675 = vpow2.f32 %v1562_v34 }
 0x798   : > { %v1676_v35 = vpop.eup %1675 }
 0x799   : > { %v1255_v36 = vadd.f32 1.0, %v1676_v35 }
 0x79b   : > { %1677 = vrcp.f32 %v1255_v36  ;;  %v1267_v40 = vand.u32 2147483648, %v1255_v36  ;;  %v1265_v41 = vand.u32 2147483647, %v1255_v36  ;;  %vm1261_vm8 = vweird.f32 %v1255_v36 }
 0x79c   : > { %1679 = vrcp.f32 %v1770_v63 }
 0x79d   : > { %v1268_v43 = vor.u32 1.1754944e-38, %v1267_v40  ;;  %vm1266_vm10 = vcmp.eq.f32.partialorder %v1265_v41, 8.507059e+37  ;;  %v1634_v40 = vld [vmem:[%s2144_s14] ss:$0 sm:$0xff] }
 0x7a1   : > { %v1678_v37 = vpop.eup %1677 }
 0x7a2   : > { %v1257_v38 = vmul.f32 %v1678_v37, %v1255_v36  ;;  %vm1262_vm7 = vweird.f32 %v1678_v37  ;;  %v1680_v0 = vpop.eup %1679 }
 0x7a3   : > { %vm1263_vm9 = vmor %vm1261_vm8, %vm1262_vm7  ;;  %v1338_v1 = vmul.f32 4.0, %v1680_v0  ;;  %vm1342_vm11 = vweird.f32 %v1680_v0 }
 0x7a4   : > { %v1258_v39 = vsub.f32 1.0, %v1257_v38 }
 0x7a5   : > { %v1339_v2 = vsub.f32 1.0, %v1338_v1 }
 0x7a6   : > { %v1259_v28 = vmul.f32 %v1678_v37, %v1258_v39 }
 0x7a7   : > { %v1340_v3 = vmul.f32 %v1680_v0, %v1339_v2 }
 0x7a8   : > { %v1260_v42 = vadd.f32 %v1678_v37, %v1259_v28 }
 0x7a9   : > { %v1341_v4 = vadd.f32 %v1680_v0, %v1340_v3 }
 0x7aa   : > { %v1264_v44 = vsel %vm1263_vm9, %v1678_v37, %v1260_v42  ;;  %v1633_v37 = vld [vmem:[%s2143_s13] ss:$0 sm:$0xff] }
 0x7ab   : > { %v1269_v45 = vsel %vm1266_vm10, %v1268_v43, %v1264_v44  ;;  %v1343_v5 = vsel %vm1342_vm11, %v1680_v0, %v1341_v4  ;;  %vm1448_vm11 = vcmask 97280  }
 0x7ac   : > { %v1271_v46 = vperm.slane %v1269_v45, 0 }
 0x7ae   : > { %v1272_v47 = vmul.f32 %v1271_v46, %v2019_v26  ;;  %v1632_v26 = vld [vmem:[%s2142_s12] ss:$0 sm:$0xff] }
 0x7b0   : > { %1278 = vrot.lane.b32.xlu1 %v1272_v47, %s2161_s27  ;;  %1274 = vrot.lane.b32.xlu2 %v1272_v47, %s2162_s23  ;;  %s2164_s27 = smov 8   ;;  %s1772_s23 = smov 12  }
 0x7b1   : > { %1276 = vrot.lane.b32.xlu0 %v1272_v47, %s2163_s2  ;;  %1563 = vmatmul.msk.f32.vlgmr.msra.gmra.mxu0 %vm1106_vm3, %v1272_v47  ;;  %s483_s2 = sand.u32 1, %s1743_s19  }
 0x7b2   : > { %s1530_s16 = sshll.u32 %s483_s2, 3  ;;  %s1452_s22 = scalar_lea.sflag [#allocation3], %s483_s2 }
 0x7b3   : > { %s485_s17 = scalar_lea.vmem [#allocation2], %s1530_s16 }
 0x80a   : > { %v1275_v48 = vpop.permute.xlu2 %1274 }
 0x80b   : > { %1564 = vmatmul.msk.f32.gmra.mxu0 %vm1106_vm3, %v1275_v48 }
 0x822   : > { %v1279_v50 = vpop.permute.xlu1 %1278 }
 0x823   : > { %v1277_v49 = vpop.permute.xlu0 %1276 }
 0x824   : > { %1565 = vmatmul.msk.f32.vlgmr.msrb.gmra.mxu1 %vm1106_vm3, %v1277_v49 }
 0x82c   : > { %1566 = vmatmul.msk.f32.gmra.mxu1 %vm1106_vm3, %v1279_v50 }
 0x82e   : > { %v1311_v51 = vpop.f32.mrf.mxu0 }
 0x82f   : > { %v1312_v55 = vadd.f32 %v1632_v26, %v1311_v51 }
 0x831   : > { %v1325_v56 = vsel %vm502_vm1, %v1312_v55, 0.0 }
 0x888   : > { %v1314_v52 = vpop.f32.mrf.mxu0 }
 0x889   : > { %v1315_v53 = vadd.f32 %v1632_v26, %v1314_v52 }
 0x88b   : > { %v1328_v54 = vsel %vm502_vm1, %v1315_v53, 0.0 }
 0x88c   : > { %1329 = vadd.xlane.f32.xlu0 %v1328_v54 }
 0x894   : > { %1326 = vadd.xlane.f32.xlu0 %v1325_v56 }
 0x8a1   : > { %v1317_v57 = vpop.f32.mrf.mxu1 }
 0x8a2   : > { %v1318_v58 = vadd.f32 %v1632_v26, %v1317_v57 }
 0x8a4   : > { %v1331_v59 = vsel %vm502_vm1, %v1318_v58, 0.0 }
 0x8a5   : > { %1332 = vadd.xlane.f32.xlu2 %v1331_v59 }
 0x8a9   : > { %v1320_v60 = vpop.f32.mrf.mxu1 }
 0x8aa   : > { %v1321_v61 = vadd.f32 %v1632_v26, %v1320_v60 }
 0x8ac   : > { %v1334_v62 = vsel %vm502_vm1, %v1321_v61, 0.0 }
 0x8ad   : > { %1335 = vadd.xlane.f32.xlu1 %v1334_v62 }
 0x8ff   : > { %v1330_v6 = vpop.xlane.xlu0 %1329 }
 0x900   : > { %v1345_v7 = vmul.f32 %v1343_v5, %v1330_v6 }
 0x902   : > { %v1349_v8 = vsub.f32 %v1315_v53, %v1345_v7 }
 0x904   : > { %v1353_v9 = vmul.f32 %v1349_v8, %v1349_v8 }
 0x906   : > { %v1359_v10 = vsel %vm502_vm1, %v1353_v9, 0.0 }
 0x907   : > { %1360 = vadd.xlane.f32.xlu2 %v1359_v10  ;;  %v1327_v11 = vpop.xlane.xlu0 %1326 }
 0x908   : > { %v1344_v14 = vmul.f32 %v1343_v5, %v1327_v11 }
 0x90a   : > { %v2074_v17 = vsub.f32 %v1312_v55, %v1344_v14 }
 0x90c   : > { %v1352_v22 = vmul.f32 %v2074_v17, %v2074_v17 }
 0x90e   : > { %v1356_v25 = vsel %vm502_vm1, %v1352_v22, 0.0 }
 0x918   : > { %v1333_v12 = vpop.xlane.xlu2 %1332 }
 0x919   : > { %v1346_v13 = vmul.f32 %v1343_v5, %v1333_v12 }
 0x91b   : > { %v2070_v15 = vsub.f32 %v1318_v58, %v1346_v13 }
 0x91d   : > { %v1354_v16 = vmul.f32 %v2070_v15, %v2070_v15 }
 0x91f   : > { %v1362_v18 = vsel %vm502_vm1, %v1354_v16, 0.0 }
 0x920   : > { %v1336_v19 = vpop.xlane.xlu1 %1335  ;;  %1363 = vadd.xlane.f32.xlu0 %v1362_v18 }
 0x921   : > { %v1347_v20 = vmul.f32 %v1343_v5, %v1336_v19 }
 0x923   : > { %v2077_v21 = vsub.f32 %v1321_v61, %v1347_v20 }
 0x925   : > { %v1355_v23 = vmul.f32 %v2077_v21, %v2077_v21 }
 0x927   : > { %v1365_v24 = vsel %vm502_vm1, %v1355_v23, 0.0 }
 0x928   : > { %1366 = vadd.xlane.f32.xlu2 %v1365_v24  ;;  %1357 = vadd.xlane.f32.xlu0 %v1356_v25 }
 0x97a   : > { %v1361_v27 = vpop.xlane.xlu2 %1360 }
 0x97b   : > { %v1369_v29 = vmul.f32 %v1361_v27, %v1343_v5 }
 0x97d   : > { %v1373_v30 = vadd.f32 1e-05, %v1369_v29 }
 0x97f   : > { %1681 = vrsqrt.f32 %v1373_v30  ;;  %vm1392_vm13 = vweird.f32 %v1373_v30 }
 0x985   : > { %v1682_v31 = vpop.eup %1681 }
 0x986   : > { %v1387_v32 = vmul.f32 %v1682_v31, %v1373_v30  ;;  %vm1393_vm12 = vweird.f32 %v1682_v31 }
 0x987   : > { %vm1394_vm14 = vmor %vm1392_vm13, %vm1393_vm12 }
 0x988   : > { %v1388_v33 = vmul.f32 %v1682_v31, %v1387_v32 }
 0x98a   : > { %v1389_v34 = vmul.f32 0.5, %v1388_v33 }
 0x98c   : > { %v1390_v35 = vsub.f32 1.5, %v1389_v34 }
 0x98e   : > { %v1391_v36 = vmul.f32 %v1682_v31, %v1390_v35 }
 0x990   : > { %v1395_v38 = vsel %vm1394_vm14, %v1682_v31, %v1391_v36 }
 0x991   : > { %v1417_v39 = vmul.f32 %v1395_v38, %v1349_v8 }
 0x993   : > { %v1364_v28 = vpop.xlane.xlu0 %1363  ;;  %v1424_v41 = vmul.f32 %v1633_v37, %v1417_v39 }
 0x994   : > { %v1370_v42 = vmul.f32 %v1364_v28, %v1343_v5 }
 0x995   : > { %v1431_v43 = vadd.f32 %v1634_v40, %v1424_v41 }
 0x996   : > { %v1374_v44 = vadd.f32 1e-05, %v1370_v42 }
 0x997   : > { %1435 = vrot.lane.b32.xlu1 %v1431_v43, %s1771_s1  ;;  %s1464_s1 = sshll.u32 %s485_s17, 4  ;;  %s1465_s1 = int_to_ptr.vmem [resolvable:$true] %s1464_s1 }
 0x998   : > { %1683 = vrsqrt.f32 %v1374_v44  ;;  %vm1402_vm0 = vweird.f32 %v1374_v44 }
 0x99b   : > { %v1367_v45 = vpop.xlane.xlu2 %1366  ;;  %v1358_v46 = vpop.xlane.xlu0 %1357 }
 0x99c   : > { %v1371_v47 = vmul.f32 %v1367_v45, %v1343_v5  ;;  %v1368_v48 = vmul.f32 %v1358_v46, %v1343_v5 }
 0x99e   : > { %v1684_v49 = vpop.eup %1683  ;;  %v1375_v50 = vadd.f32 1e-05, %v1371_v47  ;;  %v1372_v51 = vadd.f32 1e-05, %v1368_v48 }
 0x99f   : > { %v1397_v26 = vmul.f32 %v1684_v49, %v1374_v44  ;;  %vm1403_vm15 = vweird.f32 %v1684_v49 }
 0x9a0   : > { %1685 = vrsqrt.f32 %v1375_v50  ;;  %vm1404_vm4 = vmor %vm1402_vm0, %vm1403_vm15  ;;  %vm1412_vm7 = vweird.f32 %v1375_v50  ;;  %vm1382_vm9 = vweird.f32 %v1372_v51 }
 0x9a1   : > { %v1398_v52 = vmul.f32 %v1684_v49, %v1397_v26  ;;  %1687 = vrsqrt.f32 %v1372_v51 }
 0x9a3   : > { %v1399_v53 = vmul.f32 0.5, %v1398_v52 }
 0x9a5   : > { %v1400_v54 = vsub.f32 1.5, %v1399_v53 }
 0x9a6   : > { %v1686_v55 = vpop.eup %1685 }
 0x9a7   : > { %v1688_v56 = vpop.eup %1687  ;;  %v1401_v57 = vmul.f32 %v1684_v49, %v1400_v54  ;;  %v1407_v58 = vmul.f32 %v1686_v55, %v1375_v50  ;;  %vm1413_vm5 = vweird.f32 %v1686_v55 }
 0x9a8   : > { %v1377_v59 = vmul.f32 %v1688_v56, %v1372_v51  ;;  %vm1383_vm6 = vweird.f32 %v1688_v56  ;;  %vm1414_vm8 = vmor %vm1412_vm7, %vm1413_vm5 }
 0x9a9   : > { %v1405_v60 = vsel %vm1404_vm4, %v1684_v49, %v1401_v57  ;;  %v1408_v61 = vmul.f32 %v1686_v55, %v1407_v58  ;;  %vm1384_vm10 = vmor %vm1382_vm9, %vm1383_vm6 }
 0x9aa   : > { %v1378_v62 = vmul.f32 %v1688_v56, %v1377_v59  ;;  %v1418_v63 = vmul.f32 %v1405_v60, %v2070_v15 }
 0x9ab   : > { %v1409_v0 = vmul.f32 0.5, %v1408_v61 }
 0x9ac   : > { %v1379_v1 = vmul.f32 0.5, %v1378_v62  ;;  %v1425_v2 = vmul.f32 %v1633_v37, %v1418_v63 }
 0x9ad   : > { %v1410_v3 = vsub.f32 1.5, %v1409_v0 }
 0x9ae   : > { %v1380_v4 = vsub.f32 1.5, %v1379_v1  ;;  %v1432_v5 = vadd.f32 %v1634_v40, %v1425_v2 }
 0x9af   : > { %v1411_v6 = vmul.f32 %v1686_v55, %v1410_v3 }
 0x9b0   : > { %v1381_v7 = vmul.f32 %v1688_v56, %v1380_v4  ;;  %1439 = vrot.lane.b32.xlu2 %v1432_v5, %s2164_s27  ;;  %s1466_s27 = sshll.u32 %s1462_s0, 4  ;;  %s1467_s27 = int_to_ptr.hbm [resolvable:$true] %s1466_s27 }
 0x9b1   : > { %v1415_v8 = vsel %vm1414_vm8, %v1686_v55, %v1411_v6 }
 0x9b2   : > { %v1385_v9 = vsel %vm1384_vm10, %v1688_v56, %v1381_v7  ;;  %v1419_v10 = vmul.f32 %v1415_v8, %v2077_v21 }
 0x9b3   : > { %v1416_v11 = vmul.f32 %v1385_v9, %v2074_v17 }
 0x9b4   : > { %v1426_v12 = vmul.f32 %v1633_v37, %v1419_v10 }
 0x9b5   : > { %v1423_v13 = vmul.f32 %v1633_v37, %v1416_v11 }
 0x9b6   : > { %v1433_v14 = vadd.f32 %v1634_v40, %v1426_v12 }
 0x9b7   : > { %v1430_v15 = vadd.f32 %v1634_v40, %v1423_v13 }
 0x9b8   : > { %1443 = vrot.lane.b32.xlu0 %v1433_v14, %s1772_s23  ;;  %s1703_s23 = sshra.s32 %s1467_s27, 4  ;;  %s1704_s23 = int_to_ptr.hbm [resolvable:$true] %s1703_s23 }
 0x9b9   : > { %s1705_s30 = scalar_lea.hbm %s1704_s23, 8  ;;  %p1710_p0 = scmp.lt.s32.totalorder %s1704_s23, %s2145_s15 }
 0x9ba   : > { %p1706_p11 = scmp.ne.s32.totalorder %s1704_s23, %s1705_s30  ;;  %p1711_p1 = scmp.lt.s32.totalorder %s1709_s25, %s1705_s30 }
 0x9bc   : > { %p1707_p12 = pnand %p1706_p11, %p1891_p5  ;;  %p1712_p2 = por %p1711_p1, %p1710_p0 }
 0x9be   : > { %p1708_p13 = pneg %p1707_p12 }
 0x9c0   : > { %p1713_p3 = pnand %p1712_p2, %p1708_p13 }
 0xa09   : > { %v1436_v16 = vpop.permute.xlu1 %1435 }
 0xa0a   : > { %v1446_v18 = vsel %vm502_vm1, %v1430_v15, %v1436_v16  ;;  %v1440_v19 = vpop.permute.xlu2 %1439 }
 0xa0b   : > { %v1447_v17 = vsel %vm590_vm2, %v1446_v18, %v1440_v19 }
 0xa2a   : > { %v1444_v20 = vpop.permute.xlu0 %1443 }
 0xa2b   : > { %v1449_v21 = vsel %vm1448_vm11, %v1447_v17, %v1444_v20 }
 0xa2c   : > { %1450 = vst.msk [vmem:[%s485_s17] sm:$0xff] %vm1106_vm3, %v1449_v21 }
 0xa2d   : > { %1716 = shalt.err (!%p1713_p3)
}
 0xa2e   : > { %1573 = dma.vmem_to_hbm [thread:$0]  (%p1891_p5), %s1465_s1, 128, %s1467_s27, %s1452_s22  }
 0xa2f PF: > { %p1579_p4 = scmp.ge.s32.totalorder %s1751_s21, 2  ;;  %s1478_s2 = sand.u32 1, %s1739_s18  }
 0xa30   : > { %s1479_s17 = scalar_lea.sflag [#allocation3], %s1478_s2 }
 0xa31   : > { %p1576_p7 = pnand %p1579_p4, %p1895_p6 }
 0xa33   : > { %p1577_p8 = pneg %p1576_p7 }
 0xa35   : > { %1734 = dma.done.wait (%p1577_p8), %s1479_s17, 128  }
 0xa36   : > { %1736 = vsyncadd (%p1577_p8), %s1479_s17, 4294967168  ;;  %s2165_s3 = sld [smem:[#allocation5_spill]]  ;;  %p25_p9 = scmp.ge.s32.totalorder %s1878_s24, 4  }
 0xa37   : > { %s2166_s18 = smov %s1743_s19  ;;  %s2167_s19 = smov %s1747_s20 }
 0xa38   : > { %s2169_s21 = smov %s1878_s24  ;;  %27 = sbr.rel (!%p25_p9) target bundleno = 8 (0x8), region = 115 }
 0xa3c   : > { %s2168_s20 = smov %s2165_s3 }
 0xa3d   :  { %1485 = vsyncpa [#allocation3], 1 }
 0xa3e   :  { %1487 = vsyncpa [#allocation3 + $0x1], 1 }

</bundles_post_ra>
